<compile_context>
chip_gen: v5e
topology: v5e:2x2
jax: 0.10.0
libtpu: 0.0.40
codegen_flags: <defaults>
</compile_context>

<pallas_src>
import jax
import jax.numpy as jnp
from jax.experimental import pallas as pl
from jax.experimental.pallas import tpu as pltpu

INPUT_DIM = 42
EMBED_DIM = 256
HIDDEN_DIM = 2 * EMBED_DIM
OUTPUT_DIM = 1
BN_EPS = 1e-5


def _round_up(n, m):
    return (n + m - 1) // m * m


def _make_kernel(batch, tile_b, needs_mask):
    """batch = real (unpadded) batch size; tile_b = rows per grid tile."""
    inv_b = 1.0 / float(batch)

    def kernel(x_ref,
               w1_ref, g1_ref, be1_ref,
               w2_ref, g2_ref, be2_ref,
               w3_ref, b3_ref,
               o_ref,
               s1, q1, s2, q2, sc1, sh1, sc2, sh2):
        p = pl.program_id(0)   # phase: 0 = BN1 stats, 1 = BN2 stats, 2 = output
        t = pl.program_id(1)   # batch tile

        @pl.when(jnp.logical_and(p == 0, t == 0))
        def _init_stats():
            s1[...] = jnp.zeros_like(s1)
            q1[...] = jnp.zeros_like(q1)
            s2[...] = jnp.zeros_like(s2)
            q2[...] = jnp.zeros_like(q2)

        # bf16 operands feed the MXU; stats / BN affine / accumulation in f32.
        x16 = x_ref[...].astype(jnp.bfloat16)

        def linear1():
            return jnp.dot(x16, w1_ref[...], preferred_element_type=jnp.float32)

        def bn1_relu(h1):
            return jnp.maximum(h1 * sc1[...] + sh1[...], 0.0)

        def finalize(s_ref, q_ref, g_ref, be_ref, sc_ref, sh_ref):
            mean = s_ref[...] * inv_b
            var = jnp.maximum(q_ref[...] * inv_b - mean * mean, 0.0)  # clamp cancellation
            sc = g_ref[...] * jax.lax.rsqrt(var + BN_EPS)
            sc_ref[...] = sc
            sh_ref[...] = be_ref[...] - mean * sc

        @pl.when(p == 0)
        def _phase0():
            # Padded x rows are zero -> h1 rows are exactly zero -> no mask needed.
            h1 = linear1()
            s1[...] += jnp.sum(h1, axis=0, keepdims=True)
            q1[...] += jnp.sum(h1 * h1, axis=0, keepdims=True)

        @pl.when(p == 1)
        def _phase1():
            @pl.when(t == 0)
            def _():
                finalize(s1, q1, g1_ref, be1_ref, sc1, sh1)
            a1 = bn1_relu(linear1())
            if needs_mask:
                # Padded rows give relu(shift1) != 0; zero them so they do not
                # pollute the BN2 batch statistics.
                row = t * tile_b + jax.lax.broadcasted_iota(jnp.int32, (tile_b, 1), 0)
                a1 = jnp.where(row < batch, a1, 0.0)
            h2 = jnp.dot(a1.astype(jnp.bfloat16), w2_ref[...],
                         preferred_element_type=jnp.float32)
            s2[...] += jnp.sum(h2, axis=0, keepdims=True)
            q2[...] += jnp.sum(h2 * h2, axis=0, keepdims=True)

        @pl.when(p == 2)
        def _phase2():
            @pl.when(t == 0)
            def _():
                finalize(s2, q2, g2_ref, be2_ref, sc2, sh2)
            a1 = bn1_relu(linear1())
            h2 = jnp.dot(a1.astype(jnp.bfloat16), w2_ref[...],
                         preferred_element_type=jnp.float32)
            a2 = jnp.maximum(h2 * sc2[...] + sh2[...], 0.0)
            # Linear(512 -> 1): VPU multiply + lane reduction (skip the MXU).
            o_ref[...] = (jnp.sum(a2 * w3_ref[...], axis=-1, keepdims=True)
                          + b3_ref[0])

    return kernel


def value_agent_forward(x, params, *, tile_b=512):
    """Fused ValueAgent forward (training-mode BatchNorm, batch statistics).

    x: (B, ...) -> flattened to (B, 42) like the PyTorch module.
    tile_b: rows per grid tile (multiple of 8; sweep for best perf).
    """
    B = int(x.shape[0])
    x2d = x.reshape(B, -1).astype(jnp.float32)
    assert x2d.shape[1] == INPUT_DIM, x2d.shape

    (w1, b1, g1, be1, w2, b2, g2, be2, w3, b3) = params
    # Per-feature Linear bias immediately before training-mode BN is cancelled
    # exactly by the mean subtraction -> dead work, dropped.
    del b1, b2

    tile_b = max(8, _round_up(int(tile_b), 8))
    tile_b = min(tile_b, _round_up(B, 8))
    B_pad = _round_up(B, tile_b)
    num_tiles = B_pad // tile_b
    needs_mask = (B_pad != B)
    if needs_mask:
        x2d = jnp.pad(x2d, ((0, B_pad - B), (0, 0)))

    args = (
        x2d,
        w1.astype(jnp.bfloat16),                          # (42, 256)  bf16 at rest
        g1.reshape(1, EMBED_DIM).astype(jnp.float32),
        be1.reshape(1, EMBED_DIM).astype(jnp.float32),
        w2.astype(jnp.bfloat16),                          # (256, 512) bf16 at rest
        g2.reshape(1, HIDDEN_DIM).astype(jnp.float32),
        be2.reshape(1, HIDDEN_DIM).astype(jnp.float32),
        w3.reshape(1, HIDDEN_DIM).astype(jnp.float32),    # (1, 512) row for VPU layer
        b3.reshape(1).astype(jnp.float32),                # scalar in SMEM
    )

    def resident(shape):
        return pl.BlockSpec(shape, lambda p, t: (0, 0))   # weights stay VMEM-resident

    in_specs = [
        pl.BlockSpec((tile_b, INPUT_DIM), lambda p, t: (t, 0)),   # x, per batch tile
        resident((INPUT_DIM, EMBED_DIM)),
        resident((1, EMBED_DIM)),
        resident((1, EMBED_DIM)),
        resident((EMBED_DIM, HIDDEN_DIM)),
        resident((1, HIDDEN_DIM)),
        resident((1, HIDDEN_DIM)),
        resident((1, HIDDEN_DIM)),
        pl.BlockSpec(memory_space=pltpu.MemorySpace.SMEM),        # b3 scalar
    ]
    out_specs = pl.BlockSpec((tile_b, OUTPUT_DIM), lambda p, t: (t, 0))

    scratch = [
        pltpu.VMEM((1, EMBED_DIM), jnp.float32),    # s1  (BN1 sum)
        pltpu.VMEM((1, EMBED_DIM), jnp.float32),    # q1  (BN1 sum of squares)
        pltpu.VMEM((1, HIDDEN_DIM), jnp.float32),   # s2
        pltpu.VMEM((1, HIDDEN_DIM), jnp.float32),   # q2
        pltpu.VMEM((1, EMBED_DIM), jnp.float32),    # sc1 (BN1 scale)
        pltpu.VMEM((1, EMBED_DIM), jnp.float32),    # sh1 (BN1 shift)
        pltpu.VMEM((1, HIDDEN_DIM), jnp.float32),   # sc2
        pltpu.VMEM((1, HIDDEN_DIM), jnp.float32),   # sh2
    ]

    out = pl.pallas_call(
        _make_kernel(B, tile_b, needs_mask),
        out_shape=jax.ShapeDtypeStruct((B_pad, OUTPUT_DIM), jnp.float32),
        grid_spec=pltpu.PrefetchScalarGridSpec(
            num_scalar_prefetch=0,
            grid=(3, num_tiles),          # (phase, batch-tile); phase outermost
            in_specs=in_specs,
            out_specs=out_specs,
            scratch_shapes=scratch),
        # Both axes carry cross-iteration state (phase ordering, BN stat
        # accumulators) -> "arbitrary"; no blanket vmem limit now that the
        # kernel is tiled (per-tile footprint is a few MiB).
        compiler_params=pltpu.CompilerParams(
            dimension_semantics=("arbitrary", "arbitrary")),
    )(*args)
    return out[:B]


def value_agent_reference(x, params):
    """Pure-JAX f32 reference faithful to the PyTorch module (keeps b1/b2)."""
    (w1, b1, g1, be1, w2, b2, g2, be2, w3, b3) = params
    h = x.reshape(x.shape[0], -1).astype(jnp.float32)

    def bn(h, g, be):
        m = jnp.mean(h, axis=0, keepdims=True)
        v = jnp.mean((h - m) ** 2, axis=0, keepdims=True)
        return (h - m) / jnp.sqrt(v + BN_EPS) * g + be

    h = jnp.maximum(bn(h @ w1 + b1, g1, be1), 0.0)
    h = jnp.maximum(bn(h @ w2 + b2, g2, be2), 0.0)
    return h @ w3 + b3


def value_agent_reference_bf16(x, params):
    """Reference that mimics the kernel's numerics (bf16 matmul inputs, f32 accum)."""
    (w1, b1, g1, be1, w2, b2, g2, be2, w3, b3) = params
    h = x.reshape(x.shape[0], -1).astype(jnp.float32)

    def bn(h, g, be):
        m = jnp.mean(h, axis=0, keepdims=True)
        v = jnp.mean((h - m) ** 2, axis=0, keepdims=True)
        return (h - m) * jax.lax.rsqrt(v + BN_EPS) * g + be

    h1 = jnp.dot(h.astype(jnp.bfloat16), w1.astype(jnp.bfloat16),
                 preferred_element_type=jnp.float32)
    a1 = jnp.maximum(bn(h1 + b1, g1, be1), 0.0)
    h2 = jnp.dot(a1.astype(jnp.bfloat16), w2.astype(jnp.bfloat16),
                 preferred_element_type=jnp.float32)
    a2 = jnp.maximum(bn(h2 + b2, g2, be2), 0.0)
    return a2 @ w3 + b3


def init_params(key):
    """Deterministic synthetic parameters (shapes match the nn.Module).

    Linear weights are stored pre-transposed as (in, out); w1/w2 are kept in
    bf16 at rest so the per-call parameter DMA is halved.
    """
    ks = jax.random.split(key, 10)
    w1 = (jax.random.normal(ks[0], (INPUT_DIM, EMBED_DIM), jnp.float32)
          * (1.0 / INPUT_DIM ** 0.5)).astype(jnp.bfloat16)
    b1 = jax.random.normal(ks[1], (EMBED_DIM,), jnp.float32) * 0.01
    g1 = 1.0 + 0.1 * jax.random.normal(ks[2], (EMBED_DIM,), jnp.float32)
    be1 = 0.1 * jax.random.normal(ks[3], (EMBED_DIM,), jnp.float32)

    w2 = (jax.random.normal(ks[4], (EMBED_DIM, HIDDEN_DIM), jnp.float32)
          * (1.0 / EMBED_DIM ** 0.5)).astype(jnp.bfloat16)
    b2 = jax.random.normal(ks[5], (HIDDEN_DIM,), jnp.float32) * 0.01
    g2 = 1.0 + 0.1 * jax.random.normal(ks[6], (HIDDEN_DIM,), jnp.float32)
    be2 = 0.1 * jax.random.normal(ks[7], (HIDDEN_DIM,), jnp.float32)

    w3 = jax.random.normal(ks[8], (HIDDEN_DIM, OUTPUT_DIM), jnp.float32) \
        * (1.0 / HIDDEN_DIM ** 0.5)
    b3 = jax.random.normal(ks[9], (OUTPUT_DIM,), jnp.float32) * 0.01

    return (w1, b1, g1, be1, w2, b2, g2, be2, w3, b3)


if __name__ == "__main__":
    key = jax.random.PRNGKey(0)
    kx, kp = jax.random.split(key)
    params = init_params(kp)

    # Case 1: smoke test, (B, 6, 7) board -> flattened to 42 features; single tile.
    x1 = jax.random.normal(kx, (64, 6, 7), jnp.float32)
    out1 = jax.block_until_ready(value_agent_forward(x1, params))
    assert out1.shape == (64, OUTPUT_DIM), out1.shape
    ref1 = value_agent_reference_bf16(x1, params)
    assert jnp.allclose(out1, ref1, atol=1e-2, rtol=1e-2), \
        float(jnp.max(jnp.abs(out1 - ref1)))
    ref1_f32 = value_agent_reference(x1, params)
    assert jnp.allclose(out1, ref1_f32, atol=1e-1, rtol=1e-1), \
        float(jnp.max(jnp.abs(out1 - ref1_f32)))

    # Case 2: exercise the multi-tile + padded/masked path (B=50, tile_b=16 -> 4 tiles).
    x2 = jax.random.normal(jax.random.fold_in(kx, 1), (50, INPUT_DIM), jnp.float32)
    out2 = jax.block_until_ready(value_agent_forward(x2, params, tile_b=16))
    assert out2.shape == (50, OUTPUT_DIM), out2.shape
    ref2 = value_agent_reference_bf16(x2, params)
    assert jnp.allclose(out2, ref2, atol=1e-2, rtol=1e-2), \
        float(jnp.max(jnp.abs(out2 - ref2)))

    print("KERNEL_OK")
</pallas_src>

<mosaic_0001>
module attributes {stable_mosaic.version = 11 : i64} {
  func.func @kernel(%arg0: i32, %arg1: i32, %arg2: memref<64x42xf32, #tpu.memory_space<vmem>>, %arg3: memref<42x256xbf16, #tpu.memory_space<vmem>>, %arg4: memref<1x256xf32, #tpu.memory_space<vmem>>, %arg5: memref<1x256xf32, #tpu.memory_space<vmem>>, %arg6: memref<256x512xbf16, #tpu.memory_space<vmem>>, %arg7: memref<1x512xf32, #tpu.memory_space<vmem>>, %arg8: memref<1x512xf32, #tpu.memory_space<vmem>>, %arg9: memref<1x512xf32, #tpu.memory_space<vmem>>, %arg10: memref<1xf32, #tpu.memory_space<smem>>, %arg11: memref<64x1xf32, #tpu.memory_space<vmem>>, %arg12: memref<1x256xf32, #tpu.memory_space<vmem>>, %arg13: memref<1x256xf32, #tpu.memory_space<vmem>>, %arg14: memref<1x512xf32, #tpu.memory_space<vmem>>, %arg15: memref<1x512xf32, #tpu.memory_space<vmem>>, %arg16: memref<1x256xf32, #tpu.memory_space<vmem>>, %arg17: memref<1x256xf32, #tpu.memory_space<vmem>>, %arg18: memref<1x512xf32, #tpu.memory_space<vmem>>, %arg19: memref<1x512xf32, #tpu.memory_space<vmem>>) attributes {dimension_semantics = [#tpu.dimension_semantics<arbitrary>, #tpu.dimension_semantics<arbitrary>], iteration_bounds = array<i64: 3, 1>, scalar_prefetch = 0 : i64, scratch_operands = 8 : i64, tpu.core_type = #tpu.core_type<tc>, window_params = [{transform_indices = @transform_0, window_bounds = array<i64: 64, 42>}, {pipeline_mode = #tpu.pipeline_mode<synchronous>, transform_indices = @transform_1, window_bounds = array<i64: 42, 256>}, {pipeline_mode = #tpu.pipeline_mode<synchronous>, transform_indices = @transform_2, window_bounds = array<i64: 1, 256>}, {pipeline_mode = #tpu.pipeline_mode<synchronous>, transform_indices = @transform_3, window_bounds = array<i64: 1, 256>}, {pipeline_mode = #tpu.pipeline_mode<synchronous>, transform_indices = @transform_4, window_bounds = array<i64: 256, 512>}, {pipeline_mode = #tpu.pipeline_mode<synchronous>, transform_indices = @transform_5, window_bounds = array<i64: 1, 512>}, {pipeline_mode = #tpu.pipeline_mode<synchronous>, transform_indices = @transform_6, window_bounds = array<i64: 1, 512>}, {pipeline_mode = #tpu.pipeline_mode<synchronous>, transform_indices = @transform_7, window_bounds = array<i64: 1, 512>}, {transform_indices = @transform_8, window_bounds = array<i64: 1>}, {transform_indices = @transform_9, window_bounds = array<i64: 64, 1>}]} {
    %c0_i32 = arith.constant 0 : i32
    %0 = arith.cmpi eq, %arg0, %c0_i32 : i32
    %c0_i32_0 = arith.constant 0 : i32
    %1 = arith.cmpi eq, %arg1, %c0_i32_0 : i32
    %2 = arith.andi %0, %1 : i1
    %3 = arith.extui %2 : i1 to i32
    %c0_i32_1 = arith.constant 0 : i32
    %4 = arith.cmpi ne, %3, %c0_i32_1 : i32
    scf.if %4 {
      %cst = arith.constant 0.000000e+00 : f32
      %16 = vector.broadcast %cst : f32 to vector<1x256xf32>
      %c0_7 = arith.constant 0 : index
      %c0_8 = arith.constant 0 : index
      %17 = vector.load %arg12[%c0_7, %c0_8] : memref<1x256xf32, #tpu.memory_space<vmem>>, vector<1x256xf32>
      tpu.vector_store %arg12[%c0_7, %c0_8], %16 {strides = array<i32>} : memref<1x256xf32, #tpu.memory_space<vmem>>, vector<1x256xf32>,
      %cst_9 = arith.constant 0.000000e+00 : f32
      %18 = vector.broadcast %cst_9 : f32 to vector<1x256xf32>
      %c0_10 = arith.constant 0 : index
      %c0_11 = arith.constant 0 : index
      %19 = vector.load %arg13[%c0_10, %c0_11] : memref<1x256xf32, #tpu.memory_space<vmem>>, vector<1x256xf32>
      tpu.vector_store %arg13[%c0_10, %c0_11], %18 {strides = array<i32>} : memref<1x256xf32, #tpu.memory_space<vmem>>, vector<1x256xf32>,
      %cst_12 = arith.constant 0.000000e+00 : f32
      %20 = vector.broadcast %cst_12 : f32 to vector<1x512xf32>
      %c0_13 = arith.constant 0 : index
      %c0_14 = arith.constant 0 : index
      %21 = vector.load %arg14[%c0_13, %c0_14] : memref<1x512xf32, #tpu.memory_space<vmem>>, vector<1x512xf32>
      tpu.vector_store %arg14[%c0_13, %c0_14], %20 {strides = array<i32>} : memref<1x512xf32, #tpu.memory_space<vmem>>, vector<1x512xf32>,
      %cst_15 = arith.constant 0.000000e+00 : f32
      %22 = vector.broadcast %cst_15 : f32 to vector<1x512xf32>
      %c0_16 = arith.constant 0 : index
      %c0_17 = arith.constant 0 : index
      %23 = vector.load %arg15[%c0_16, %c0_17] : memref<1x512xf32, #tpu.memory_space<vmem>>, vector<1x512xf32>
      tpu.vector_store %arg15[%c0_16, %c0_17], %22 {strides = array<i32>} : memref<1x512xf32, #tpu.memory_space<vmem>>, vector<1x512xf32>,
    } else {
    }
    %c0 = arith.constant 0 : index
    %c0_2 = arith.constant 0 : index
    %5 = vector.load %arg2[%c0, %c0_2] : memref<64x42xf32, #tpu.memory_space<vmem>>, vector<64x42xf32>
    %6 = arith.truncf %5 : vector<64x42xf32> to vector<64x42xbf16>
    %c0_i32_3 = arith.constant 0 : i32
    %7 = arith.cmpi eq, %arg0, %c0_i32_3 : i32
    %8 = arith.extui %7 : i1 to i32
    %c0_i32_4 = arith.constant 0 : i32
    %9 = arith.cmpi ne, %8, %c0_i32_4 : i32
    scf.if %9 {
      %c0_7 = arith.constant 0 : index
      %c0_8 = arith.constant 0 : index
      %16 = vector.load %arg3[%c0_7, %c0_8] : memref<42x256xbf16, #tpu.memory_space<vmem>>, vector<42x256xbf16>
      %cst = arith.constant dense<0.000000e+00> : vector<64x256xf32>
      %17 = tpu.matmul %6, %16, %cst {dimension_numbers = #tpu.dot_dimension_numbers<[1], [0], [0], [1], [0, 0, 1, 1], [], []>} : vector<64x42xbf16>, vector<42x256xbf16>, vector<64x256xf32> -> vector<64x256xf32>
      %c0_9 = arith.constant 0 : index
      %c0_10 = arith.constant 0 : index
      %18 = vector.load %arg12[%c0_9, %c0_10] : memref<1x256xf32, #tpu.memory_space<vmem>>, vector<1x256xf32>
      %cst_11 = arith.constant dense<0.000000e+00> : vector<256xf32>
      %19 = vector.multi_reduction <add>, %17, %cst_11 [0] : vector<64x256xf32> to vector<256xf32>
      %20 = vector.shape_cast %19 : vector<256xf32> to vector<1x256xf32>
      %21 = arith.addf %18, %20 : vector<1x256xf32>
      %c0_12 = arith.constant 0 : index
      %c0_13 = arith.constant 0 : index
      %22 = vector.load %arg12[%c0_12, %c0_13] : memref<1x256xf32, #tpu.memory_space<vmem>>, vector<1x256xf32>
      tpu.vector_store %arg12[%c0_12, %c0_13], %21 {strides = array<i32>} : memref<1x256xf32, #tpu.memory_space<vmem>>, vector<1x256xf32>,
      %c0_14 = arith.constant 0 : index
      %c0_15 = arith.constant 0 : index
      %23 = vector.load %arg13[%c0_14, %c0_15] : memref<1x256xf32, #tpu.memory_space<vmem>>, vector<1x256xf32>
      %24 = arith.mulf %17, %17 : vector<64x256xf32>
      %cst_16 = arith.constant dense<0.000000e+00> : vector<256xf32>
      %25 = vector.multi_reduction <add>, %24, %cst_16 [0] : vector<64x256xf32> to vector<256xf32>
      %26 = vector.shape_cast %25 : vector<256xf32> to vector<1x256xf32>
      %27 = arith.addf %23, %26 : vector<1x256xf32>
      %c0_17 = arith.constant 0 : index
      %c0_18 = arith.constant 0 : index
      %28 = vector.load %arg13[%c0_17, %c0_18] : memref<1x256xf32, #tpu.memory_space<vmem>>, vector<1x256xf32>
      tpu.vector_store %arg13[%c0_17, %c0_18], %27 {strides = array<i32>} : memref<1x256xf32, #tpu.memory_space<vmem>>, vector<1x256xf32>,
    } else {
    }
    %c1_i32 = arith.constant 1 : i32
    %10 = arith.cmpi eq, %arg0, %c1_i32 : i32
    %11 = arith.extui %10 : i1 to i32
    %c0_i32_5 = arith.constant 0 : i32
    %12 = arith.cmpi ne, %11, %c0_i32_5 : i32
    scf.if %12 {
      %c0_i32_7 = arith.constant 0 : i32
      %16 = arith.cmpi eq, %arg1, %c0_i32_7 : i32
      %17 = arith.extui %16 : i1 to i32
      %c0_i32_8 = arith.constant 0 : i32
      %18 = arith.cmpi ne, %17, %c0_i32_8 : i32
      scf.if %18 {
        %c0_29 = arith.constant 0 : index
        %c0_30 = arith.constant 0 : index
        %43 = vector.load %arg12[%c0_29, %c0_30] : memref<1x256xf32, #tpu.memory_space<vmem>>, vector<1x256xf32>
        %cst_31 = arith.constant 1.562500e-02 : f32
        %44 = vector.broadcast %cst_31 : f32 to vector<1x256xf32>
        %45 = arith.mulf %43, %44 : vector<1x256xf32>
        %c0_32 = arith.constant 0 : index
        %c0_33 = arith.constant 0 : index
        %46 = vector.load %arg13[%c0_32, %c0_33] : memref<1x256xf32, #tpu.memory_space<vmem>>, vector<1x256xf32>
        %cst_34 = arith.constant 1.562500e-02 : f32
        %47 = vector.broadcast %cst_34 : f32 to vector<1x256xf32>
        %48 = arith.mulf %46, %47 : vector<1x256xf32>
        %49 = arith.mulf %45, %45 : vector<1x256xf32>
        %50 = arith.subf %48, %49 : vector<1x256xf32>
        %cst_35 = arith.constant 0.000000e+00 : f32
        %51 = vector.broadcast %cst_35 : f32 to vector<1x256xf32>
        %52 = arith.maximumf %50, %51 : vector<1x256xf32>
        %c0_36 = arith.constant 0 : index
        %c0_37 = arith.constant 0 : index
        %53 = vector.load %arg4[%c0_36, %c0_37] : memref<1x256xf32, #tpu.memory_space<vmem>>, vector<1x256xf32>
        %cst_38 = arith.constant 9.99999974E-6 : f32
        %54 = vector.broadcast %cst_38 : f32 to vector<1x256xf32>
        %55 = arith.addf %52, %54 : vector<1x256xf32>
        %56 = math.rsqrt %55 : vector<1x256xf32>
        %57 = arith.mulf %53, %56 : vector<1x256xf32>
        %c0_39 = arith.constant 0 : index
        %c0_40 = arith.constant 0 : index
        %58 = vector.load %arg16[%c0_39, %c0_40] : memref<1x256xf32, #tpu.memory_space<vmem>>, vector<1x256xf32>
        tpu.vector_store %arg16[%c0_39, %c0_40], %57 {strides = array<i32>} : memref<1x256xf32, #tpu.memory_space<vmem>>, vector<1x256xf32>,
        %c0_41 = arith.constant 0 : index
        %c0_42 = arith.constant 0 : index
        %59 = vector.load %arg5[%c0_41, %c0_42] : memref<1x256xf32, #tpu.memory_space<vmem>>, vector<1x256xf32>
        %60 = arith.mulf %45, %57 : vector<1x256xf32>
        %61 = arith.subf %59, %60 : vector<1x256xf32>
        %c0_43 = arith.constant 0 : index
        %c0_44 = arith.constant 0 : index
        %62 = vector.load %arg17[%c0_43, %c0_44] : memref<1x256xf32, #tpu.memory_space<vmem>>, vector<1x256xf32>
        tpu.vector_store %arg17[%c0_43, %c0_44], %61 {strides = array<i32>} : memref<1x256xf32, #tpu.memory_space<vmem>>, vector<1x256xf32>,
      } else {
      }
      %c0_9 = arith.constant 0 : index
      %c0_10 = arith.constant 0 : index
      %19 = vector.load %arg3[%c0_9, %c0_10] : memref<42x256xbf16, #tpu.memory_space<vmem>>, vector<42x256xbf16>
      %cst = arith.constant dense<0.000000e+00> : vector<64x256xf32>
      %20 = tpu.matmul %6, %19, %cst {dimension_numbers = #tpu.dot_dimension_numbers<[1], [0], [0], [1], [0, 0, 1, 1], [], []>} : vector<64x42xbf16>, vector<42x256xbf16>, vector<64x256xf32> -> vector<64x256xf32>
      %c0_11 = arith.constant 0 : index
      %c0_12 = arith.constant 0 : index
      %21 = vector.load %arg16[%c0_11, %c0_12] : memref<1x256xf32, #tpu.memory_space<vmem>>, vector<1x256xf32>
      %22 = vector.broadcast %21 : vector<1x256xf32> to vector<64x256xf32>
      %23 = arith.mulf %20, %22 : vector<64x256xf32>
      %c0_13 = arith.constant 0 : index
      %c0_14 = arith.constant 0 : index
      %24 = vector.load %arg17[%c0_13, %c0_14] : memref<1x256xf32, #tpu.memory_space<vmem>>, vector<1x256xf32>
      %25 = vector.broadcast %24 : vector<1x256xf32> to vector<64x256xf32>
      %26 = arith.addf %23, %25 : vector<64x256xf32>
      %cst_15 = arith.constant 0.000000e+00 : f32
      %27 = vector.broadcast %cst_15 : f32 to vector<64x256xf32>
      %28 = arith.maximumf %26, %27 : vector<64x256xf32>
      %29 = arith.truncf %28 : vector<64x256xf32> to vector<64x256xbf16>
      %c0_16 = arith.constant 0 : index
      %c0_17 = arith.constant 0 : index
      %30 = vector.load %arg6[%c0_16, %c0_17] : memref<256x512xbf16, #tpu.memory_space<vmem>>, vector<256x512xbf16>
      %cst_18 = arith.constant dense<0.000000e+00> : vector<64x512xf32>
      %31 = tpu.matmul %29, %30, %cst_18 {dimension_numbers = #tpu.dot_dimension_numbers<[1], [0], [0], [1], [0, 0, 1, 1], [], []>} : vector<64x256xbf16>, vector<256x512xbf16>, vector<64x512xf32> -> vector<64x512xf32>
      %c0_19 = arith.constant 0 : index
      %c0_20 = arith.constant 0 : index
      %32 = vector.load %arg14[%c0_19, %c0_20] : memref<1x512xf32, #tpu.memory_space<vmem>>, vector<1x512xf32>
      %cst_21 = arith.constant dense<0.000000e+00> : vector<512xf32>
      %33 = vector.multi_reduction <add>, %31, %cst_21 [0] : vector<64x512xf32> to vector<512xf32>
      %34 = vector.shape_cast %33 : vector<512xf32> to vector<1x512xf32>
      %35 = arith.addf %32, %34 : vector<1x512xf32>
      %c0_22 = arith.constant 0 : index
      %c0_23 = arith.constant 0 : index
      %36 = vector.load %arg14[%c0_22, %c0_23] : memref<1x512xf32, #tpu.memory_space<vmem>>, vector<1x512xf32>
      tpu.vector_store %arg14[%c0_22, %c0_23], %35 {strides = array<i32>} : memref<1x512xf32, #tpu.memory_space<vmem>>, vector<1x512xf32>,
      %c0_24 = arith.constant 0 : index
      %c0_25 = arith.constant 0 : index
      %37 = vector.load %arg15[%c0_24, %c0_25] : memref<1x512xf32, #tpu.memory_space<vmem>>, vector<1x512xf32>
      %38 = arith.mulf %31, %31 : vector<64x512xf32>
      %cst_26 = arith.constant dense<0.000000e+00> : vector<512xf32>
      %39 = vector.multi_reduction <add>, %38, %cst_26 [0] : vector<64x512xf32> to vector<512xf32>
      %40 = vector.shape_cast %39 : vector<512xf32> to vector<1x512xf32>
      %41 = arith.addf %37, %40 : vector<1x512xf32>
      %c0_27 = arith.constant 0 : index
      %c0_28 = arith.constant 0 : index
      %42 = vector.load %arg15[%c0_27, %c0_28] : memref<1x512xf32, #tpu.memory_space<vmem>>, vector<1x512xf32>
      tpu.vector_store %arg15[%c0_27, %c0_28], %41 {strides = array<i32>} : memref<1x512xf32, #tpu.memory_space<vmem>>, vector<1x512xf32>,
    } else {
    }
    %c2_i32 = arith.constant 2 : i32
    %13 = arith.cmpi eq, %arg0, %c2_i32 : i32
    %14 = arith.extui %13 : i1 to i32
    %c0_i32_6 = arith.constant 0 : i32
    %15 = arith.cmpi ne, %14, %c0_i32_6 : i32
    scf.if %15 {
      %c0_i32_7 = arith.constant 0 : i32
      %16 = arith.cmpi eq, %arg1, %c0_i32_7 : i32
      %17 = arith.extui %16 : i1 to i32
      %c0_i32_8 = arith.constant 0 : i32
      %18 = arith.cmpi ne, %17, %c0_i32_8 : i32
      scf.if %18 {
        %c0_30 = arith.constant 0 : index
        %c0_31 = arith.constant 0 : index
        %49 = vector.load %arg14[%c0_30, %c0_31] : memref<1x512xf32, #tpu.memory_space<vmem>>, vector<1x512xf32>
        %cst_32 = arith.constant 1.562500e-02 : f32
        %50 = vector.broadcast %cst_32 : f32 to vector<1x512xf32>
        %51 = arith.mulf %49, %50 : vector<1x512xf32>
        %c0_33 = arith.constant 0 : index
        %c0_34 = arith.constant 0 : index
        %52 = vector.load %arg15[%c0_33, %c0_34] : memref<1x512xf32, #tpu.memory_space<vmem>>, vector<1x512xf32>
        %cst_35 = arith.constant 1.562500e-02 : f32
        %53 = vector.broadcast %cst_35 : f32 to vector<1x512xf32>
        %54 = arith.mulf %52, %53 : vector<1x512xf32>
        %55 = arith.mulf %51, %51 : vector<1x512xf32>
        %56 = arith.subf %54, %55 : vector<1x512xf32>
        %cst_36 = arith.constant 0.000000e+00 : f32
        %57 = vector.broadcast %cst_36 : f32 to vector<1x512xf32>
        %58 = arith.maximumf %56, %57 : vector<1x512xf32>
        %c0_37 = arith.constant 0 : index
        %c0_38 = arith.constant 0 : index
        %59 = vector.load %arg7[%c0_37, %c0_38] : memref<1x512xf32, #tpu.memory_space<vmem>>, vector<1x512xf32>
        %cst_39 = arith.constant 9.99999974E-6 : f32
        %60 = vector.broadcast %cst_39 : f32 to vector<1x512xf32>
        %61 = arith.addf %58, %60 : vector<1x512xf32>
        %62 = math.rsqrt %61 : vector<1x512xf32>
        %63 = arith.mulf %59, %62 : vector<1x512xf32>
        %c0_40 = arith.constant 0 : index
        %c0_41 = arith.constant 0 : index
        %64 = vector.load %arg18[%c0_40, %c0_41] : memref<1x512xf32, #tpu.memory_space<vmem>>, vector<1x512xf32>
        tpu.vector_store %arg18[%c0_40, %c0_41], %63 {strides = array<i32>} : memref<1x512xf32, #tpu.memory_space<vmem>>, vector<1x512xf32>,
        %c0_42 = arith.constant 0 : index
        %c0_43 = arith.constant 0 : index
        %65 = vector.load %arg8[%c0_42, %c0_43] : memref<1x512xf32, #tpu.memory_space<vmem>>, vector<1x512xf32>
        %66 = arith.mulf %51, %63 : vector<1x512xf32>
        %67 = arith.subf %65, %66 : vector<1x512xf32>
        %c0_44 = arith.constant 0 : index
        %c0_45 = arith.constant 0 : index
        %68 = vector.load %arg19[%c0_44, %c0_45] : memref<1x512xf32, #tpu.memory_space<vmem>>, vector<1x512xf32>
        tpu.vector_store %arg19[%c0_44, %c0_45], %67 {strides = array<i32>} : memref<1x512xf32, #tpu.memory_space<vmem>>, vector<1x512xf32>,
      } else {
      }
      %c0_9 = arith.constant 0 : index
      %c0_10 = arith.constant 0 : index
      %19 = vector.load %arg3[%c0_9, %c0_10] : memref<42x256xbf16, #tpu.memory_space<vmem>>, vector<42x256xbf16>
      %cst = arith.constant dense<0.000000e+00> : vector<64x256xf32>
      %20 = tpu.matmul %6, %19, %cst {dimension_numbers = #tpu.dot_dimension_numbers<[1], [0], [0], [1], [0, 0, 1, 1], [], []>} : vector<64x42xbf16>, vector<42x256xbf16>, vector<64x256xf32> -> vector<64x256xf32>
      %c0_11 = arith.constant 0 : index
      %c0_12 = arith.constant 0 : index
      %21 = vector.load %arg16[%c0_11, %c0_12] : memref<1x256xf32, #tpu.memory_space<vmem>>, vector<1x256xf32>
      %22 = vector.broadcast %21 : vector<1x256xf32> to vector<64x256xf32>
      %23 = arith.mulf %20, %22 : vector<64x256xf32>
      %c0_13 = arith.constant 0 : index
      %c0_14 = arith.constant 0 : index
      %24 = vector.load %arg17[%c0_13, %c0_14] : memref<1x256xf32, #tpu.memory_space<vmem>>, vector<1x256xf32>
      %25 = vector.broadcast %24 : vector<1x256xf32> to vector<64x256xf32>
      %26 = arith.addf %23, %25 : vector<64x256xf32>
      %cst_15 = arith.constant 0.000000e+00 : f32
      %27 = vector.broadcast %cst_15 : f32 to vector<64x256xf32>
      %28 = arith.maximumf %26, %27 : vector<64x256xf32>
      %29 = arith.truncf %28 : vector<64x256xf32> to vector<64x256xbf16>
      %c0_16 = arith.constant 0 : index
      %c0_17 = arith.constant 0 : index
      %30 = vector.load %arg6[%c0_16, %c0_17] : memref<256x512xbf16, #tpu.memory_space<vmem>>, vector<256x512xbf16>
      %cst_18 = arith.constant dense<0.000000e+00> : vector<64x512xf32>
      %31 = tpu.matmul %29, %30, %cst_18 {dimension_numbers = #tpu.dot_dimension_numbers<[1], [0], [0], [1], [0, 0, 1, 1], [], []>} : vector<64x256xbf16>, vector<256x512xbf16>, vector<64x512xf32> -> vector<64x512xf32>
      %c0_19 = arith.constant 0 : index
      %c0_20 = arith.constant 0 : index
      %32 = vector.load %arg18[%c0_19, %c0_20] : memref<1x512xf32, #tpu.memory_space<vmem>>, vector<1x512xf32>
      %33 = vector.broadcast %32 : vector<1x512xf32> to vector<64x512xf32>
      %34 = arith.mulf %31, %33 : vector<64x512xf32>
      %c0_21 = arith.constant 0 : index
      %c0_22 = arith.constant 0 : index
      %35 = vector.load %arg19[%c0_21, %c0_22] : memref<1x512xf32, #tpu.memory_space<vmem>>, vector<1x512xf32>
      %36 = vector.broadcast %35 : vector<1x512xf32> to vector<64x512xf32>
      %37 = arith.addf %34, %36 : vector<64x512xf32>
      %cst_23 = arith.constant 0.000000e+00 : f32
      %38 = vector.broadcast %cst_23 : f32 to vector<64x512xf32>
      %39 = arith.maximumf %37, %38 : vector<64x512xf32>
      %c0_24 = arith.constant 0 : index
      %c0_25 = arith.constant 0 : index
      %40 = vector.load %arg9[%c0_24, %c0_25] : memref<1x512xf32, #tpu.memory_space<vmem>>, vector<1x512xf32>
      %41 = vector.broadcast %40 : vector<1x512xf32> to vector<64x512xf32>
      %42 = arith.mulf %39, %41 : vector<64x512xf32>
      %cst_26 = arith.constant dense<0.000000e+00> : vector<64xf32>
      %43 = vector.multi_reduction <add>, %42, %cst_26 [1] : vector<64x512xf32> to vector<64xf32>
      %44 = vector.shape_cast %43 : vector<64xf32> to vector<64x1xf32>
      %c0_27 = arith.constant 0 : index
      %45 = memref.load %arg10[%c0_27] : memref<1xf32, #tpu.memory_space<smem>>
      %46 = vector.broadcast %45 : f32 to vector<64x1xf32>
      %47 = arith.addf %44, %46 : vector<64x1xf32>
      %c0_28 = arith.constant 0 : index
      %c0_29 = arith.constant 0 : index
      %48 = vector.load %arg11[%c0_28, %c0_29] : memref<64x1xf32, #tpu.memory_space<vmem>>, vector<64x1xf32>
      tpu.vector_store %arg11[%c0_28, %c0_29], %47 {strides = array<i32>} : memref<64x1xf32, #tpu.memory_space<vmem>>, vector<64x1xf32>,
    } else {
    }
    return
  }
  func.func @transform_0(%arg0: i32, %arg1: i32) -> (i32, i32) {
    %c0_i32 = arith.constant 0 : i32
    %c0_i32_0 = arith.constant 0 : i32
    return %arg1, %c0_i32 : i32, i32
  }
  func.func @transform_1(%arg0: i32, %arg1: i32) -> (i32, i32) {
    %c0_i32 = arith.constant 0 : i32
    %c0_i32_0 = arith.constant 0 : i32
    %c0_i32_1 = arith.constant 0 : i32
    return %c0_i32, %c0_i32_0 : i32, i32
  }
  func.func @transform_2(%arg0: i32, %arg1: i32) -> (i32, i32) {
    %c0_i32 = arith.constant 0 : i32
    %c0_i32_0 = arith.constant 0 : i32
    %c0_i32_1 = arith.constant 0 : i32
    return %c0_i32, %c0_i32_0 : i32, i32
  }
  func.func @transform_3(%arg0: i32, %arg1: i32) -> (i32, i32) {
    %c0_i32 = arith.constant 0 : i32
    %c0_i32_0 = arith.constant 0 : i32
    %c0_i32_1 = arith.constant 0 : i32
    return %c0_i32, %c0_i32_0 : i32, i32
  }
  func.func @transform_4(%arg0: i32, %arg1: i32) -> (i32, i32) {
    %c0_i32 = arith.constant 0 : i32
    %c0_i32_0 = arith.constant 0 : i32
    %c0_i32_1 = arith.constant 0 : i32
    return %c0_i32, %c0_i32_0 : i32, i32
  }
  func.func @transform_5(%arg0: i32, %arg1: i32) -> (i32, i32) {
    %c0_i32 = arith.constant 0 : i32
    %c0_i32_0 = arith.constant 0 : i32
    %c0_i32_1 = arith.constant 0 : i32
    return %c0_i32, %c0_i32_0 : i32, i32
  }
  func.func @transform_6(%arg0: i32, %arg1: i32) -> (i32, i32) {
    %c0_i32 = arith.constant 0 : i32
    %c0_i32_0 = arith.constant 0 : i32
    %c0_i32_1 = arith.constant 0 : i32
    return %c0_i32, %c0_i32_0 : i32, i32
  }
  func.func @transform_7(%arg0: i32, %arg1: i32) -> (i32, i32) {
    %c0_i32 = arith.constant 0 : i32
    %c0_i32_0 = arith.constant 0 : i32
    %c0_i32_1 = arith.constant 0 : i32
    return %c0_i32, %c0_i32_0 : i32, i32
  }
  func.func @transform_8(%arg0: i32, %arg1: i32) -> i32 {
    %c0_i32 = arith.constant 0 : i32
    %c0_i32_0 = arith.constant 0 : i32
    return %c0_i32 : i32
  }
  func.func @transform_9(%arg0: i32, %arg1: i32) -> (i32, i32) {
    %c0_i32 = arith.constant 0 : i32
    %c0_i32_0 = arith.constant 0 : i32
    return %arg1, %c0_i32 : i32, i32
  }
}

</mosaic_0001>

<bundles_post_ra>
// kernel: tpu_custom_call.1
= control target key start
LH: loop header
LB: loop body
LE: loop exit
PB: predicated region body
PF: predicated region fallthrough
CT: control target
= control target key end

     0   :  { %s4275_s0 = inlined_call_operand.vmem [shape: f32[64,42], index: 0, kind: input, shape index: {}]   ;;  %s4276_s1 = inlined_call_operand.vmem [shape: bf16[42,256], index: 1, kind: input, shape index: {}]   ;;  %s4277_s2 = inlined_call_operand.vmem [shape: f32[1,256], index: 2, kind: input, shape index: {}]   ;;  %s4278_s3 = inlined_call_operand.vmem [shape: f32[1,256], index: 3, kind: input, shape index: {}]   ;;  %s4279_s4 = inlined_call_operand.hbm [shape: bf16[256,512], index: 4, kind: input, shape index: {}]   ;;  %s4280_s5 = inlined_call_operand.vmem [shape: f32[1,512], index: 5, kind: input, shape index: {}]   ;;  %s4281_s6 = inlined_call_operand.vmem [shape: f32[1,512], index: 6, kind: input, shape index: {}]   ;;  %s4282_s7 = inlined_call_operand.vmem [shape: f32[1,512], index: 7, kind: input, shape index: {}]   ;;  %s4283_s8 = inlined_call_operand.<no memory space> [shape: f32[1], index: 8, kind: input, shape index: {}]   ;;  %s4284_s9 = inlined_call_operand.vmem [shape: f32[64,1], index: 9, kind: output, shape index: {}]  }
   0x1   :  { %14 = sst [smem:[#allocation10]] %s4283_s8 }
   0x2   :  { %15 = vsyncpa [#allocation12], 0  ;;  %s3672_s11 = smov 0   ;;  %s3674_s12 = smov 0  }
   0x3   :  { %s3676_s13 = smov 0  }
   0x4 LB: > { %s2728_s8 = sadd.s32 4294967295, %s3613_s13   ;;  %s33_s14 = sadd.s32 1, %s3609_s12  ;;  %s3613_s13 = sphi %s3676_s13, %s21_s13   ;;  %s3609_s12 = sphi %s3674_s12, %s4286_s12   ;;  %s3605_s11 = sphi %s3672_s11, %s4285_s11  }
   0x5   : > { %p35_p0 = scmp.ge.s32.totalorder %s33_s14, 3  ;;  %p2729_p1 = scmp.ge.s32.totalorder %s3613_s13, 1 }
   0x6   : > { %p258_p2 = scmp.lt.s32.totalorder %s3613_s13, 4  ;;  %p3523_p4 = scmp.eq.s32.totalorder %s2728_s8, 0 }
   0x7   : > { %s4288_s14 = smov (%p35_p0, %s33_s14), 0  ;;  %s287_s17 = sshll.u32 %s4279_s4, 4  ;;  %s288_s17 = int_to_ptr.hbm [resolvable:$true] %s287_s17 }
   0x8   : > { %p259_p3 = pnand %p2729_p1, %p258_p2  ;;  %s3615_s18 = smov [#allocation11]  }
   0x9   : > { %s289_s19 = sshll.u32 %s3615_s18, 4  ;;  %s3616_s20 = smov 256   ;;  %s290_s19 = int_to_ptr.vmem [resolvable:$true] %s289_s19 }
   0xa   : > { %p3519_p5 = pneg %p259_p3  ;;  %s3617_s21 = smov 16  }
   0xb   : > { %317 = sbr.rel (%p259_p3) target bundleno = 1220 (0x4c4), region = 56 }
   0xc   : > { %p3520_p6 = pnand %p3523_p4, %p3519_p5 }
   0xe   : > { %3522 = dma.hbm_to_vmem [thread:$0]  (!%p3520_p6), %s288_s17, 8192, %s290_s19, [#allocation12], %s3616_s20, %s3616_s20, %s3617_s21  }
  0x10   : > { %3600 = dma.done.wait (%p3523_p4), [#allocation12], 8192  }
  0x11   : > { %3602 = vsyncadd (%p3523_p4), [#allocation12], 4294959104  ;;  %p367_p7 = scmp.eq.s32.totalorder %s3605_s11, 0 }
  0x12   : > { %v373_v0 = vlaneseq (%p367_p7)  ;;  %v3618_v1 = vmov (%p367_p7), 0.0  }
  0x13   : > { %372 = sbr.rel (!%p367_p7) target bundleno = 25 (0x19), region = 64 }
  0x14   : > { %vm375_vm0 = vcmp.lt.s32.totalorder (%p367_p7), %v373_v0, 256  ;;  %vm379_vm1 = vcmp.lt.s32.totalorder (%p367_p7), %v373_v0, 512 }
  0x15   : > { %377 = vst.msk [vmem:[#allocation2] sm:$0x3] (%p367_p7), %vm375_vm0, %v3618_v1 }
  0x16   : > { %378 = vst.msk [vmem:[#allocation3] sm:$0x3] (%p367_p7), %vm375_vm0, %v3618_v1 }
  0x17   : > { %381 = vst.msk [vmem:[#allocation4] sm:$0xf] (%p367_p7), %vm379_vm1, %v3618_v1 }
  0x18   : > { %382 = vst.msk [vmem:[#allocation5] sm:$0xf] %vm379_vm1, %v3618_v1 }
  0x19 PF: > { %v383_v2 = vld [vmem:[%s4275_s0] sm:$0xff]  ;;  %v384_v3 = vld [vmem:[%s4275_s0 + $0x8] sm:$0xff]  ;;  %v385_v4 = vld [vmem:[%s4275_s0 + $0x10] sm:$0xff]  ;;  %p2735_p8 = scmp.ne.s32.totalorder %s3605_s11, 0 }
  0x1a   : > { %v386_v5 = vld [vmem:[%s4275_s0 + $0x18] sm:$0xff]  ;;  %v387_v6 = vld [vmem:[%s4275_s0 + $0x20] sm:$0xff]  ;;  %v388_v7 = vld [vmem:[%s4275_s0 + $0x28] sm:$0xff]  ;;  %v3715_v8 = vpack.c.bf16 %v384_v3, %v383_v2 }
  0x1b   : > { %v389_v9 = vld [vmem:[%s4275_s0 + $0x30] sm:$0xff]  ;;  %v390_v10 = vld [vmem:[%s4275_s0 + $0x38] sm:$0xff]  ;;  %v3723_v11 = vpack.c.bf16 %v386_v5, %v385_v4  ;;  %v3725_v12 = vpack.c.bf16 %v388_v7, %v387_v6  ;;  %397 = sbr.rel (%p2735_p8) target bundleno = 228 (0xe4), region = 68 }
  0x1c   : > { %v3727_v13 = vpack.c.bf16 %v390_v10, %v389_v9 }
  0x20   : > { %v2754_v14 = vld [vmem:[%s4276_s1 + $0x20] sm:$0xf]  ;;  %v3356_v15 = vld [vmem:[%s4276_s1 + $0x24] sm:$0x10]  ;;  %vm445_vm2 = vcmask 1044480   ;;  %vm432_vm3 = vcmask 343040  }
  0x21   : > { %v2755_v16 = vor.u32 %v3356_v15, %v2754_v14  ;;  %v3355_v17 = vld [vmem:[%s4276_s1 + $0x24] sm:$0xf]  ;;  %v2756_v18 = vld [vmem:[%s4276_s1 + $0x28] sm:$0x10]  ;;  %v2746_v19 = vld [vmem:[%s4276_s1 + $0x10] sm:$0xf] }
  0x22   : > { %v2759_v20 = vor.u32 %v3355_v17, %v2756_v18  ;;  %v3354_v21 = vld [vmem:[%s4276_s1 + $0x14] sm:$0xf0]  ;;  %v3353_v22 = vld [vmem:[%s4276_s1 + $0x14] sm:$0xf]  ;;  %v2748_v23 = vld [vmem:[%s4276_s1 + $0x18] sm:$0xf0] }
  0x23   : > { %v447_v24 = vsel %vm445_vm2, %v2755_v16, 0  ;;  %v2747_v26 = vor.u32 %v3354_v21, %v2746_v19  ;;  %v2751_v27 = vor.u32 %v3353_v22, %v2748_v23  ;;  %v2738_v28 = vld [vmem:[%s4276_s1] sm:$0xf]  ;;  %v3352_v29 = vld [vmem:[%s4276_s1 + $0x4] sm:$0xf0]  ;;  %vm540_vm4 = vcmask 1040384  }
  0x24   : > { %457 = vmatpush.bf16.msra.mxu0 %v447_v24  ;;  %3497 = vmatpush.bf16.msra.mxu2 %v447_v24  ;;  %v450_v25 = vsel %vm445_vm2, %v2759_v20, 0  ;;  %v3351_v30 = vld [vmem:[%s4276_s1 + $0x4] sm:$0xf]  ;;  %v2740_v31 = vld [vmem:[%s4276_s1 + $0x8] sm:$0xf0]  ;;  %v2739_v32 = vor.u32 %v3352_v29, %v2738_v28 }
  0x25   : > { %486 = vmatpush.bf16.msra.mxu1 %v450_v25  ;;  %3500 = vmatpush.bf16.msra.mxu3 %v450_v25  ;;  %v2743_v33 = vor.u32 %v3351_v30, %v2740_v31 }
  0x28   : > { %458 = vmatpush.bf16.msra.mxu0 %v2747_v26  ;;  %3498 = vmatpush.bf16.msra.mxu2 %v2747_v26 }
  0x29   : > { %487 = vmatpush.bf16.msra.mxu1 %v2751_v27  ;;  %3501 = vmatpush.bf16.msra.mxu3 %v2751_v27 }
  0x2c   : > { %459 = vmatpush.bf16.msra.mxu0 %v2739_v32  ;;  %3499 = vmatpush.bf16.msra.mxu2 %v2739_v32 }
  0x2d   : > { %488 = vmatpush.bf16.msra.mxu1 %v2743_v33  ;;  %3502 = vmatpush.bf16.msra.mxu3 %v2743_v33 }
  0x2f   : > { %2760 = vmatmul.msk.bf16.vlgmr.msra.gmra.mxu0 %vm432_vm3, %v3715_v8  ;;  %2762 = vmatmul.msk.bf16.vlgmr.msra.gmra.mxu2 %vm432_vm3, %v3725_v12 }
  0x30   : > { %2764 = vmatmul.msk.bf16.vlgmr.msra.gmra.mxu1 %vm432_vm3, %v3715_v8  ;;  %2766 = vmatmul.msk.bf16.vlgmr.msra.gmra.mxu3 %vm432_vm3, %v3725_v12 }
  0x3f   : > { %2761 = vmatmul.msk.bf16.gmra.mxu0 %vm432_vm3, %v3723_v11  ;;  %2763 = vmatmul.msk.bf16.gmra.mxu2 %vm432_vm3, %v3727_v13 }
  0x40   : > { %2765 = vmatmul.msk.bf16.gmra.mxu1 %vm432_vm3, %v3723_v11  ;;  %2767 = vmatmul.msk.bf16.gmra.mxu3 %vm432_vm3, %v3727_v13 }
  0xac   : > { %v461_v34 = vpop.f32.mrf.mxu0 }
  0xad   : > { %v490_v35 = vpop.f32.mrf.mxu1  ;;  %v550_v46 = vmul.f32 %v461_v34, %v461_v34 }
  0xae   : > { %v551_v49 = vmul.f32 %v490_v35, %v490_v35 }
  0xb2   : > { %v471_v36 = vpop.f32.mrf.mxu2 }
  0xb3   : > { %v500_v37 = vpop.f32.mrf.mxu3  ;;  %v558_v2 = vmul.f32 %v471_v36, %v471_v36 }
  0xb4   : > { %v463_v38 = vpop.f32.mrf.mxu0  ;;  %v559_v5 = vmul.f32 %v500_v37, %v500_v37 }
  0xb5   : > { %v492_v39 = vpop.f32.mrf.mxu1  ;;  %v552_v44 = vmul.f32 %v463_v38, %v463_v38  ;;  %v511_v47 = vadd.f32 %v463_v38, %v461_v34 }
  0xb6   : > { %v553_v45 = vmul.f32 %v492_v39, %v492_v39  ;;  %v524_v50 = vadd.f32 %v492_v39, %v490_v35 }
  0xb7   : > { %v566_v53 = vadd.f32 %v552_v44, %v550_v46 }
  0xb8   : > { %v579_v56 = vadd.f32 %v553_v45, %v551_v49 }
  0xba   : > { %v473_v40 = vpop.f32.mrf.mxu2 }
  0xbb   : > { %v502_v41 = vpop.f32.mrf.mxu3  ;;  %v560_v9 = vmul.f32 %v473_v40, %v473_v40 }
  0xbc   : > { %v466_v42 = vpop.f32.mrf.mxu0  ;;  %v561_v15 = vmul.f32 %v502_v41, %v502_v41 }
  0xbd   : > { %v495_v43 = vpop.f32.mrf.mxu1  ;;  %v554_v48 = vmul.f32 %v466_v42, %v466_v42  ;;  %v512_v54 = vadd.f32 %v511_v47, %v466_v42 }
  0xbe   : > { %v555_v51 = vmul.f32 %v495_v43, %v495_v43  ;;  %v525_v57 = vadd.f32 %v524_v50, %v495_v43 }
  0xbf   : > { %v567_v59 = vadd.f32 %v566_v53, %v554_v48 }
  0xc0   : > { %v580_v63 = vadd.f32 %v579_v56, %v555_v51 }
  0xc2   : > { %v476_v52 = vpop.f32.mrf.mxu2 }
  0xc3   : > { %v505_v55 = vpop.f32.mrf.mxu3  ;;  %v562_v19 = vmul.f32 %v476_v52, %v476_v52 }
  0xc4   : > { %v468_v58 = vpop.f32.mrf.mxu0  ;;  %v563_v23 = vmul.f32 %v505_v55, %v505_v55 }
  0xc5   : > { %v513_v60 = vadd.f32 %v512_v54, %v468_v58  ;;  %v556_v61 = vmul.f32 %v468_v58, %v468_v58  ;;  %v497_v62 = vpop.f32.mrf.mxu1  ;;  %v544_v54 = vlaneseq }
  0xc6   : > { %v526_v0 = vadd.f32 %v525_v57, %v497_v62  ;;  %v557_v1 = vmul.f32 %v497_v62, %v497_v62  ;;  %v510_v57 = vld [vmem:[#allocation2] sm:$0x3]  ;;  %v549_v62 = vld [vmem:[#allocation3] sm:$0x3] }
  0xc7   : > { %v514_v3 = vadd.f32 %v513_v60, %v471_v36  ;;  %v568_v4 = vadd.f32 %v567_v59, %v556_v61  ;;  %vm546_vm5 = vcmp.lt.s32.totalorder %v544_v54, 256 }
  0xc8   : > { %v527_v6 = vadd.f32 %v526_v0, %v500_v37  ;;  %v581_v7 = vadd.f32 %v580_v63, %v557_v1 }
  0xc9   : > { %v569_v10 = vadd.f32 %v568_v4, %v558_v2  ;;  %v515_v14 = vadd.f32 %v514_v3, %v473_v40 }
  0xca   : > { %v582_v16 = vadd.f32 %v581_v7, %v559_v5  ;;  %v478_v17 = vpop.f32.mrf.mxu2  ;;  %v528_v18 = vadd.f32 %v527_v6, %v502_v41 }
  0xcb   : > { %v516_v20 = vadd.f32 %v515_v14, %v476_v52  ;;  %v570_v21 = vadd.f32 %v569_v10, %v560_v9  ;;  %v507_v22 = vpop.f32.mrf.mxu3  ;;  %v564_v27 = vmul.f32 %v478_v17, %v478_v17 }
  0xcc   : > { %v529_v24 = vadd.f32 %v528_v18, %v505_v55  ;;  %v583_v25 = vadd.f32 %v582_v16, %v561_v15  ;;  %v565_v30 = vmul.f32 %v507_v22, %v507_v22 }
  0xcd   : > { %v517_v26 = vadd.f32 %v516_v20, %v478_v17  ;;  %v571_v28 = vadd.f32 %v570_v21, %v562_v19 }
  0xce   : > { %v530_v29 = vadd.f32 %v529_v24, %v507_v22  ;;  %v584_v31 = vadd.f32 %v583_v25, %v563_v23 }
  0xcf   : > { %v518_v32 = vrot.slane %v517_v26, 4  ;;  %v572_v33 = vadd.f32 %v571_v28, %v564_v27 }
  0xd0   : > { %v531_v34 = vrot.slane %v530_v29, 4  ;;  %v585_v35 = vadd.f32 %v584_v31, %v565_v30 }
  0xd1   : > { %v519_v36 = vadd.f32 %v518_v32, %v517_v26  ;;  %v573_v37 = vrot.slane %v572_v33, 4 }
  0xd2   : > { %v532_v38 = vadd.f32 %v531_v34, %v530_v29  ;;  %v586_v39 = vrot.slane %v585_v35, 4 }
  0xd3   : > { %v520_v40 = vrot.slane %v519_v36, 2  ;;  %v574_v41 = vadd.f32 %v573_v37, %v572_v33 }
  0xd4   : > { %v533_v42 = vrot.slane %v532_v38, 2  ;;  %v587_v43 = vadd.f32 %v586_v39, %v585_v35 }
  0xd5   : > { %v521_v44 = vadd.f32 %v520_v40, %v519_v36  ;;  %v575_v45 = vrot.slane %v574_v41, 2 }
  0xd6   : > { %v534_v46 = vadd.f32 %v533_v42, %v532_v38  ;;  %v588_v47 = vrot.slane %v587_v43, 2 }
  0xd7   : > { %v576_v48 = vadd.f32 %v575_v45, %v574_v41  ;;  %v522_v49 = vrot.slane %v521_v44, 1 }
  0xd8   : > { %v535_v50 = vrot.slane %v534_v46, 1  ;;  %v589_v51 = vadd.f32 %v588_v47, %v587_v43 }
  0xd9   : > { %v577_v52 = vrot.slane %v576_v48, 1  ;;  %v523_v56 = vadd.f32 %v522_v49, %v521_v44 }
  0xda   : > { %v536_v53 = vadd.f32 %v535_v50, %v534_v46  ;;  %v590_v55 = vrot.slane %v589_v51, 1 }
  0xdb   : > { %v578_v60 = vadd.f32 %v577_v52, %v576_v48 }
  0xdc   : > { %v539_v58 = vrot.slane %v536_v53, 7  ;;  %v591_v59 = vadd.f32 %v590_v55, %v589_v51 }
  0xde   : > { %v541_v61 = vsel %vm540_vm4, %v523_v56, %v539_v58  ;;  %v594_v63 = vrot.slane %v591_v59, 7 }
  0xdf   : > { %v543_v0 = vadd.f32 %v541_v61, %v510_v57 }
  0xe0   : > { %v595_v1 = vsel %vm540_vm4, %v578_v60, %v594_v63 }
  0xe1   : > { %548 = vst.msk [vmem:[#allocation2] sm:$0x3] %vm546_vm5, %v543_v0  ;;  %v597_v2 = vadd.f32 %v595_v1, %v549_v62 }
  0xe3   : > { %598 = vst.msk [vmem:[#allocation3] sm:$0x3] %vm546_vm5, %v597_v2 }
  0xe4 PF: > { %p2768_p9 = scmp.ne.s32.totalorder %s3605_s11, 1 }
  0xe6   : > { %602 = sbr.rel (%p2768_p9) target bundleno = 670 (0x29e), region = 72 }
  0xeb   : > { %v2787_v3 = vld [vmem:[%s4276_s1 + $0x20] sm:$0xf]  ;;  %v3362_v4 = vld [vmem:[%s4276_s1 + $0x24] sm:$0x10]  ;;  %vm682_vm6 = vcmask 1044480   ;;  %vm669_vm7 = vcmask 343040  }
  0xec   : > { %v2788_v5 = vor.u32 %v3362_v4, %v2787_v3  ;;  %v3361_v6 = vld [vmem:[%s4276_s1 + $0x24] sm:$0xf]  ;;  %v2789_v7 = vld [vmem:[%s4276_s1 + $0x28] sm:$0x10]  ;;  %v2779_v9 = vld [vmem:[%s4276_s1 + $0x10] sm:$0xf] }
  0xed   : > { %v2792_v10 = vor.u32 %v3361_v6, %v2789_v7  ;;  %v3360_v14 = vld [vmem:[%s4276_s1 + $0x14] sm:$0xf0]  ;;  %v3359_v15 = vld [vmem:[%s4276_s1 + $0x14] sm:$0xf]  ;;  %v2781_v16 = vld [vmem:[%s4276_s1 + $0x18] sm:$0xf0] }
  0xee   : > { %v684_v17 = vsel %vm682_vm6, %v2788_v5, 0  ;;  %v2780_v19 = vor.u32 %v3360_v14, %v2779_v9  ;;  %v2784_v20 = vor.u32 %v3359_v15, %v2781_v16  ;;  %v2771_v21 = vld [vmem:[%s4276_s1] sm:$0xf]  ;;  %v3358_v22 = vld [vmem:[%s4276_s1 + $0x4] sm:$0xf0]  ;;  %vm1491_vm12 = vcmask 1040384  }
  0xef   : > { %694 = vmatpush.bf16.msra.mxu0 %v684_v17  ;;  %v687_v18 = vsel %vm682_vm6, %v2792_v10, 0  ;;  %3503 = vmatpush.bf16.msra.mxu2 %v684_v17  ;;  %v3357_v23 = vld [vmem:[%s4276_s1 + $0x4] sm:$0xf]  ;;  %v2773_v24 = vld [vmem:[%s4276_s1 + $0x8] sm:$0xf0]  ;;  %v2772_v29 = vor.u32 %v3358_v22, %v2771_v21  ;;  %vm1493_vm13 = vcmask 1042434  }
  0xf0   : > { %723 = vmatpush.bf16.msra.mxu1 %v687_v18  ;;  %3506 = vmatpush.bf16.msra.mxu3 %v687_v18  ;;  %v2915_v25 = vld [vmem:[#allocation11 + $0xe0] sm:$0xf]  ;;  %v3393_v26 = vld [vmem:[#allocation11 + $0xec] sm:$0xf0]  ;;  %v2776_v30 = vor.u32 %v3357_v23, %v2773_v24  ;;  %v3391_v31 = vld [vmem:[#allocation11 + $0xe4] sm:$0xf] }
  0xf1   : > { %v3043_v27 = vld [vmem:[#allocation11 + $0x1e0] sm:$0xf]  ;;  %v3425_v28 = vld [vmem:[#allocation11 + $0x1ec] sm:$0xf0]  ;;  %v2917_v32 = vld [vmem:[#allocation11 + $0xf0] sm:$0xf0]  ;;  %v2916_v33 = vor.u32 %v3393_v26, %v2915_v25 }
  0xf2   : > { %v3044_v34 = vor.u32 %v3425_v28, %v3043_v27  ;;  %v3423_v35 = vld [vmem:[#allocation11 + $0x1e4] sm:$0xf]  ;;  %v3045_v36 = vld [vmem:[#allocation11 + $0x1f0] sm:$0xf0]  ;;  %v2899_v37 = vld [vmem:[#allocation11 + $0xc0] sm:$0xf]  ;;  %v2920_v41 = vor.u32 %v3391_v31, %v2917_v32  ;;  %v626_v28 = vlaneseq }
  0xf3   : > { %695 = vmatpush.bf16.msra.mxu0 %v2780_v19  ;;  %3504 = vmatpush.bf16.msra.mxu2 %v2780_v19  ;;  %v3389_v38 = vld [vmem:[#allocation11 + $0xcc] sm:$0xf0]  ;;  %v3027_v39 = vld [vmem:[#allocation11 + $0x1c0] sm:$0xf]  ;;  %v3048_v42 = vor.u32 %v3423_v35, %v3045_v36  ;;  %v3387_v43 = vld [vmem:[#allocation11 + $0xc4] sm:$0xf] }
  0xf4   : > { %724 = vmatpush.bf16.msra.mxu1 %v2784_v20  ;;  %3507 = vmatpush.bf16.msra.mxu3 %v2784_v20  ;;  %v3421_v40 = vld [vmem:[#allocation11 + $0x1cc] sm:$0xf0]  ;;  %v2901_v44 = vld [vmem:[#allocation11 + $0xd0] sm:$0xf0]  ;;  %v3419_v45 = vld [vmem:[#allocation11 + $0x1c4] sm:$0xf]  ;;  %v2900_v46 = vor.u32 %v3389_v38, %v2899_v37 }
  0xf5   : > { %v3028_v47 = vor.u32 %v3421_v40, %v3027_v39  ;;  %v3029_v48 = vld [vmem:[#allocation11 + $0x1d0] sm:$0xf0]  ;;  %v2883_v49 = vld [vmem:[#allocation11 + $0xa0] sm:$0xf]  ;;  %v3385_v50 = vld [vmem:[#allocation11 + $0xac] sm:$0xf0]  ;;  %v2904_v56 = vor.u32 %v3387_v43, %v2901_v44 }
  0xf6   : > { %v3011_v51 = vld [vmem:[#allocation11 + $0x1a0] sm:$0xf]  ;;  %v3417_v52 = vld [vmem:[#allocation11 + $0x1ac] sm:$0xf0]  ;;  %v606_v53 = vld [vmem:[#allocation2] sm:$0x3]  ;;  %v3032_v57 = vor.u32 %v3419_v45, %v3029_v48  ;;  %v2884_v61 = vor.u32 %v3385_v50, %v2883_v49 }
  0xf7   : > { %696 = vmatpush.bf16.msra.mxu0 %v2772_v29  ;;  %3505 = vmatpush.bf16.msra.mxu2 %v2772_v29  ;;  %v3819_v54 = vmul.f32 0.015625, %v606_v53  ;;  %v608_v55 = vld [vmem:[#allocation3] sm:$0x3]  ;;  %v3383_v58 = vld [vmem:[#allocation11 + $0xa4] sm:$0xf]  ;;  %v3012_v62 = vor.u32 %v3417_v52, %v3011_v51  ;;  %vm628_vm11 = vcmp.lt.s32.totalorder %v626_v28, 256 }
  0xf8   : > { %725 = vmatpush.bf16.msra.mxu1 %v2776_v30  ;;  %3508 = vmatpush.bf16.msra.mxu3 %v2776_v30  ;;  %v2885_v59 = vld [vmem:[#allocation11 + $0xb0] sm:$0xf0]  ;;  %v609_v60 = vmul.f32 0.015625, %v608_v55  ;;  %v3415_v63 = vld [vmem:[#allocation11 + $0x1a4] sm:$0xf]  ;;  %vm1495_vm14 = vcmask 1041408  }
  0xf9   : > { %v3013_v0 = vld [vmem:[#allocation11 + $0x1b0] sm:$0xf0]  ;;  %v2867_v1 = vld [vmem:[#allocation11 + $0x80] sm:$0xf]  ;;  %v610_v2 = vmul.f32 %v3819_v54, %v3819_v54  ;;  %v3381_v3 = vld [vmem:[#allocation11 + $0x8c] sm:$0xf0]  ;;  %v2888_v7 = vor.u32 %v3383_v58, %v2885_v59 }
  0xfa   : > { %2793 = vmatmul.msk.bf16.vlgmr.msra.gmra.mxu0 %vm669_vm7, %v3715_v8  ;;  %2795 = vmatmul.msk.bf16.vlgmr.msra.gmra.mxu2 %vm669_vm7, %v3725_v12  ;;  %v2995_v4 = vld [vmem:[#allocation11 + $0x180] sm:$0xf]  ;;  %v3413_v5 = vld [vmem:[#allocation11 + $0x18c] sm:$0xf0]  ;;  %v3016_v9 = vor.u32 %v3415_v63, %v3013_v0  ;;  %v3379_v10 = vld [vmem:[#allocation11 + $0x84] sm:$0xf]  ;;  %v2868_v15 = vor.u32 %v3381_v3, %v2867_v1 }
  0xfb   : > { %1199 = vmatpush.bf16.msrb.mxu2 %v2916_v33  ;;  %2797 = vmatmul.msk.bf16.vlgmr.msra.gmra.mxu1 %vm669_vm7, %v3715_v8  ;;  %v611_v6 = vsub.f32 %v609_v60, %v610_v2  ;;  %v2869_v14 = vld [vmem:[#allocation11 + $0x90] sm:$0xf0]  ;;  %v2996_v16 = vor.u32 %v3413_v5, %v2995_v4  ;;  %v3411_v17 = vld [vmem:[#allocation11 + $0x184] sm:$0xf]  ;;  %v613_v29 = vld [vmem:[%s4277_s2] sm:$0x3] }
  0xfc   : > { %1228 = vmatpush.bf16.msrb.mxu3 %v3044_v34  ;;  %1257 = vmatpush.bf16.msrb.mxu0 %v2920_v41  ;;  %v2997_v18 = vld [vmem:[#allocation11 + $0x190] sm:$0xf0]  ;;  %v2872_v21 = vor.u32 %v3379_v10, %v2869_v14  ;;  %v631_v33 = vld [vmem:[%s4278_s3] sm:$0x3]  ;;  %v2851_v36 = vld [vmem:[#allocation11 + $0x60] sm:$0xf] }
  0xfd   : > { %2799 = vmatmul.msk.bf16.vlgmr.msra.gmra.mxu3 %vm669_vm7, %v3725_v12  ;;  %1286 = vmatpush.bf16.msrb.mxu1 %v3048_v42  ;;  %v612_v19 = vmax.f32 %v611_v6, 0.0  ;;  %v3000_v22 = vor.u32 %v3411_v17, %v2997_v18  ;;  %v3377_v37 = vld [vmem:[#allocation11 + $0x6c] sm:$0xf0]  ;;  %v2979_v39 = vld [vmem:[#allocation11 + $0x160] sm:$0xf]  ;;  %vm1501_vm15 = vcmp.lt.s32.totalorder %v626_v28, 512 }
  0xfe   : > { %v2852_v38 = vor.u32 %v3377_v37, %v2851_v36  ;;  %v3409_v40 = vld [vmem:[#allocation11 + $0x16c] sm:$0xf0]  ;;  %v3375_v42 = vld [vmem:[#allocation11 + $0x64] sm:$0xf]  ;;  %v2853_v43 = vld [vmem:[#allocation11 + $0x70] sm:$0xf0] }
  0xff   : > { %1200 = vmatpush.bf16.msrb.mxu2 %v2900_v46  ;;  %v614_v20 = vadd.f32 1e-05, %v612_v19  ;;  %v2980_v41 = vor.u32 %v3409_v40, %v2979_v39  ;;  %v2856_v44 = vor.u32 %v3375_v42, %v2853_v43  ;;  %v3407_v45 = vld [vmem:[#allocation11 + $0x164] sm:$0xf]  ;;  %v2981_v46 = vld [vmem:[#allocation11 + $0x170] sm:$0xf0] }
 0x100   : > { %1229 = vmatpush.bf16.msrb.mxu3 %v3028_v47  ;;  %1258 = vmatpush.bf16.msrb.mxu0 %v2904_v56  ;;  %v2984_v47 = vor.u32 %v3407_v45, %v2981_v46  ;;  %v2835_v48 = vld [vmem:[#allocation11 + $0x40] sm:$0xf]  ;;  %v3373_v49 = vld [vmem:[#allocation11 + $0x4c] sm:$0xf0]  ;;  %v3371_v53 = vld [vmem:[#allocation11 + $0x44] sm:$0xf] }
 0x101   : > { %1287 = vmatpush.bf16.msrb.mxu1 %v3032_v57  ;;  %3553 = vrsqrt.f32 %v614_v20  ;;  %vm621_vm8 = vweird.f32 %v614_v20  ;;  %v2963_v50 = vld [vmem:[#allocation11 + $0x140] sm:$0xf]  ;;  %v2836_v51 = vor.u32 %v3373_v49, %v2835_v48  ;;  %v3405_v52 = vld [vmem:[#allocation11 + $0x14c] sm:$0xf0]  ;;  %v3403_v57 = vld [vmem:[#allocation11 + $0x144] sm:$0xf] }
 0x102   : > { %v2964_v55 = vor.u32 %v3405_v52, %v2963_v50  ;;  %v2965_v58 = vld [vmem:[#allocation11 + $0x150] sm:$0xf0]  ;;  %v2819_v60 = vld [vmem:[#allocation11 + $0x20] sm:$0xf]  ;;  %v3401_v0 = vld [vmem:[#allocation11 + $0x12c] sm:$0xf0] }
 0x103   : > { %1201 = vmatpush.bf16.msrb.mxu2 %v2884_v61  ;;  %v2968_v59 = vor.u32 %v3403_v57, %v2965_v58  ;;  %v3369_v61 = vld [vmem:[#allocation11 + $0x2c] sm:$0xf0]  ;;  %v3367_v1 = vld [vmem:[#allocation11 + $0x24] sm:$0xf]  ;;  %v2821_v2 = vld [vmem:[#allocation11 + $0x30] sm:$0xf0] }
 0x104   : > { %1230 = vmatpush.bf16.msrb.mxu3 %v3012_v62  ;;  %1259 = vmatpush.bf16.msrb.mxu0 %v2888_v7  ;;  %v2947_v62 = vld [vmem:[#allocation11 + $0x120] sm:$0xf]  ;;  %v2820_v63 = vor.u32 %v3369_v61, %v2819_v60  ;;  %v2824_v4 = vor.u32 %v3367_v1, %v2821_v2  ;;  %v3399_v5 = vld [vmem:[#allocation11 + $0x124] sm:$0xf]  ;;  %v2949_v6 = vld [vmem:[#allocation11 + $0x130] sm:$0xf0] }
 0x105   : > { %1288 = vmatpush.bf16.msrb.mxu1 %v3016_v9  ;;  %v2948_v3 = vor.u32 %v3401_v0, %v2947_v62  ;;  %v2952_v7 = vor.u32 %v3399_v5, %v2949_v6  ;;  %v2803_v9 = vld [vmem:[#allocation11] sm:$0xf]  ;;  %v3365_v10 = vld [vmem:[#allocation11 + $0xc] sm:$0xf0]  ;;  %v3363_v17 = vld [vmem:[#allocation11 + $0x4] sm:$0xf] }
 0x106   : > { %v2931_v14 = vld [vmem:[#allocation11 + $0x100] sm:$0xf]  ;;  %v2805_v18 = vld [vmem:[#allocation11 + $0x10] sm:$0xf0]  ;;  %v2907_v42 = vld [vmem:[#allocation11 + $0xc8] sm:$0xf] }
 0x107   : > { %1202 = vmatpush.bf16.msrb.mxu2 %v2868_v15  ;;  %v3554_v23 = vpop.eup %3553  ;;  %v2804_v15 = vor.u32 %v3365_v10, %v2803_v9  ;;  %v3390_v43 = vld [vmem:[#allocation11 + $0xd4] sm:$0xf0]  ;;  %v3388_v48 = vld [vmem:[#allocation11 + $0xcc] sm:$0xf]  ;;  %v2909_v49 = vld [vmem:[#allocation11 + $0xd8] sm:$0xf0] }
 0x108   : > { %1231 = vmatpush.bf16.msrb.mxu3 %v2996_v16  ;;  %1260 = vmatpush.bf16.msrb.mxu0 %v2872_v21  ;;  %v616_v24 = vmul.f32 %v3554_v23, %v614_v20  ;;  %vm622_vm9 = vweird.f32 %v3554_v23  ;;  %v3397_v16 = vld [vmem:[#allocation11 + $0x10c] sm:$0xf0]  ;;  %v2808_v20 = vor.u32 %v3363_v17, %v2805_v18  ;;  %v3395_v21 = vld [vmem:[#allocation11 + $0x104] sm:$0xf]  ;;  %v2908_v46 = vor.u32 %v3390_v43, %v2907_v42  ;;  %v3420_v52 = vld [vmem:[#allocation11 + $0x1cc] sm:$0xf] }
 0x109   : > { %1289 = vmatpush.bf16.msrb.mxu1 %v3000_v22  ;;  %vm623_vm10 = vmor %vm621_vm8, %vm622_vm9  ;;  %v2932_v19 = vor.u32 %v3397_v16, %v2931_v14  ;;  %v2933_v22 = vld [vmem:[#allocation11 + $0x110] sm:$0xf0]  ;;  %v3019_v57 = vld [vmem:[#allocation11 + $0x1a8] sm:$0xf] }
 0x10a   : > { %2794 = vmatmul.msk.bf16.gmra.mxu0 %vm669_vm7, %v3723_v11  ;;  %2796 = vmatmul.msk.bf16.gmra.mxu2 %vm669_vm7, %v3727_v13  ;;  %v617_v25 = vmul.f32 %v3554_v23, %v616_v24  ;;  %v2923_v24 = vld [vmem:[#allocation11 + $0xe8] sm:$0xf]  ;;  %v3418_v58 = vld [vmem:[#allocation11 + $0x1b4] sm:$0xf0]  ;;  %v3384_v61 = vld [vmem:[#allocation11 + $0xac] sm:$0xf] }
 0x10b   : > { %2798 = vmatmul.msk.bf16.gmra.mxu1 %vm669_vm7, %v3723_v11  ;;  %1203 = vmatpush.bf16.msrb.mxu2 %v2852_v38  ;;  %v3020_v60 = vor.u32 %v3418_v58, %v3019_v57  ;;  %v2893_v62 = vld [vmem:[#allocation11 + $0xb8] sm:$0xf0]  ;;  %v3382_v9 = vld [vmem:[#allocation11 + $0x94] sm:$0xf0]  ;;  %v3003_v10 = vld [vmem:[#allocation11 + $0x188] sm:$0xf] }
 0x10c   : > { %v618_v26 = vmul.f32 0.5, %v617_v25  ;;  %1232 = vmatpush.bf16.msrb.mxu3 %v2980_v41  ;;  %1261 = vmatpush.bf16.msrb.mxu0 %v2856_v44  ;;  %v3394_v25 = vld [vmem:[#allocation11 + $0xf4] sm:$0xf0]  ;;  %v3035_v44 = vld [vmem:[#allocation11 + $0x1c8] sm:$0xf]  ;;  %v2896_v2 = vor.u32 %v3384_v61, %v2893_v62 }
 0x10d   : > { %2800 = vmatmul.msk.bf16.gmra.mxu3 %vm669_vm7, %v3727_v13  ;;  %1290 = vmatpush.bf16.msrb.mxu1 %v2984_v47  ;;  %v3422_v47 = vld [vmem:[#allocation11 + $0x1d4] sm:$0xf0]  ;;  %v3380_v16 = vld [vmem:[#allocation11 + $0x8c] sm:$0xf]  ;;  %v2877_v17 = vld [vmem:[#allocation11 + $0x98] sm:$0xf0] }
 0x10e   : > { %v619_v27 = vsub.f32 1.5, %v618_v26  ;;  %v3051_v26 = vld [vmem:[#allocation11 + $0x1e8] sm:$0xf]  ;;  %v3036_v50 = vor.u32 %v3422_v47, %v3035_v44  ;;  %v3378_v44 = vld [vmem:[#allocation11 + $0x74] sm:$0xf0] }
 0x10f   : > { %1204 = vmatpush.bf16.msrb.mxu2 %v2836_v51  ;;  %v2912_v51 = vor.u32 %v3388_v48, %v2909_v49  ;;  %v2859_v43 = vld [vmem:[#allocation11 + $0x68] sm:$0xf]  ;;  %v3410_v48 = vld [vmem:[#allocation11 + $0x174] sm:$0xf0]  ;;  %v3376_v49 = vld [vmem:[#allocation11 + $0x6c] sm:$0xf] }
 0x110   : > { %v620_v30 = vmul.f32 %v3554_v23, %v619_v27  ;;  %1233 = vmatpush.bf16.msrb.mxu3 %v2964_v55  ;;  %v2924_v27 = vor.u32 %v3394_v25, %v2923_v24  ;;  %v2860_v47 = vor.u32 %v3378_v44, %v2859_v43  ;;  %v3406_v62 = vld [vmem:[#allocation11 + $0x154] sm:$0xf0] }
 0x111   : > { %1291 = vmatpush.bf16.msrb.mxu1 %v2968_v59 }
 0x112   : > { %v624_v31 = vsel %vm623_vm10, %v3554_v23, %v620_v30  ;;  %v2936_v23 = vor.u32 %v3395_v21, %v2933_v22  ;;  %v3392_v30 = vld [vmem:[#allocation11 + $0xec] sm:$0xf]  ;;  %v3005_v22 = vld [vmem:[#allocation11 + $0x198] sm:$0xf0] }
 0x113   : > { %v625_v32 = vmul.f32 %v624_v31, %v613_v29  ;;  %1205 = vmatpush.bf16.msrb.mxu2 %v2820_v63  ;;  %v3426_v29 = vld [vmem:[#allocation11 + $0x1f4] sm:$0xf0]  ;;  %v2925_v31 = vld [vmem:[#allocation11 + $0xf8] sm:$0xf0]  ;;  %v3416_v63 = vld [vmem:[#allocation11 + $0x1ac] sm:$0xf] }
 0x114   : > { %1234 = vmatpush.bf16.msrb.mxu3 %v2948_v3  ;;  %v3021_v3 = vld [vmem:[#allocation11 + $0x1b8] sm:$0xf0]  ;;  %v3412_v21 = vld [vmem:[#allocation11 + $0x18c] sm:$0xf] }
 0x115   : > { %630 = vst.msk [vmem:[#allocation6] sm:$0x3] %vm628_vm11, %v625_v32  ;;  %v632_v34 = vmul.f32 %v625_v32, %v3819_v54  ;;  %v2837_v54 = vld [vmem:[#allocation11 + $0x50] sm:$0xf0]  ;;  %1292 = vmatpush.bf16.msrb.mxu1 %v2952_v7  ;;  %v3052_v32 = vor.u32 %v3426_v29, %v3051_v26  ;;  %v3024_v7 = vor.u32 %v3416_v63, %v3021_v3  ;;  %v3372_v63 = vld [vmem:[#allocation11 + $0x4c] sm:$0xf] }
 0x116   : > { %v2840_v56 = vor.u32 %v3371_v53, %v2837_v54  ;;  %v3037_v53 = vld [vmem:[#allocation11 + $0x1d8] sm:$0xf0]  ;;  %v2891_v54 = vld [vmem:[#allocation11 + $0xa8] sm:$0xf]  ;;  %v3008_v26 = vor.u32 %v3412_v21, %v3005_v22 }
 0x117   : > { %v633_v35 = vsub.f32 %v631_v33, %v632_v34  ;;  %1206 = vmatpush.bf16.msrb.mxu2 %v2804_v15  ;;  %v2928_v33 = vor.u32 %v3392_v30, %v2925_v31  ;;  %v3424_v34 = vld [vmem:[#allocation11 + $0x1ec] sm:$0xf]  ;;  %v3040_v55 = vor.u32 %v3420_v52, %v3037_v53  ;;  %v3414_v15 = vld [vmem:[#allocation11 + $0x194] sm:$0xf0] }
 0x118   : > { %1262 = vmatpush.bf16.msrb.mxu0 %v2840_v56  ;;  %1235 = vmatpush.bf16.msrb.mxu3 %v2932_v19  ;;  %v3386_v56 = vld [vmem:[#allocation11 + $0xb4] sm:$0xf0]  ;;  %v3004_v19 = vor.u32 %v3414_v15, %v3003_v10  ;;  %v3408_v52 = vld [vmem:[#allocation11 + $0x16c] sm:$0xf] }
 0x119   : > { %634 = vst.msk [vmem:[#allocation7] sm:$0x3] %vm628_vm11, %v633_v35  ;;  %1293 = vmatpush.bf16.msrb.mxu1 %v2936_v23  ;;  %v3053_v35 = vld [vmem:[#allocation11 + $0x1f8] sm:$0xf0]  ;;  %v2892_v59 = vor.u32 %v3386_v56, %v2891_v54  ;;  %v2843_v56 = vld [vmem:[#allocation11 + $0x48] sm:$0xf] }
 0x11a   : > { %v3056_v36 = vor.u32 %v3424_v34, %v3053_v35 }
 0x11b   : > { %1315 = vmatpush.bf16.msra.mxu2 %v2924_v27 }
 0x11c   : > { %1263 = vmatpush.bf16.msrb.mxu0 %v2824_v4  ;;  %1344 = vmatpush.bf16.msra.mxu3 %v3052_v32  ;;  %v747_v37 = vld [vmem:[#allocation6] sm:$0x3]  ;;  %v2875_v4 = vld [vmem:[#allocation11 + $0x88] sm:$0xf] }
 0x11d   : > { %1402 = vmatpush.bf16.msra.mxu1 %v3056_v36  ;;  %v3839_v38 = vperm.slane %v747_v37, 0  ;;  %v3841_v39 = vperm.slane %v747_v37, 1  ;;  %v2876_v14 = vor.u32 %v3382_v9, %v2875_v4 }
 0x11f   : > { %1316 = vmatpush.bf16.msra.mxu2 %v2908_v46 }
 0x120   : > { %1264 = vmatpush.bf16.msrb.mxu0 %v2808_v20  ;;  %v769_v41 = vld [vmem:[#allocation7] sm:$0x3]  ;;  %1345 = vmatpush.bf16.msra.mxu3 %v3036_v50  ;;  %v2880_v20 = vor.u32 %v3380_v16, %v2877_v17 }
 0x121   : > { %v3844_v1 = vperm.slane %v769_v41, 0  ;;  %1403 = vmatpush.bf16.msra.mxu1 %v3040_v55  ;;  %v3847_v6 = vperm.slane %v769_v41, 1  ;;  %v2989_v55 = vld [vmem:[#allocation11 + $0x178] sm:$0xf0] }
 0x122   : > { %v2992_v58 = vor.u32 %v3408_v52, %v2989_v55  ;;  %v3398_v55 = vld [vmem:[#allocation11 + $0x114] sm:$0xf0] }
 0x123   : > { %1317 = vmatpush.bf16.msra.mxu2 %v2892_v59  ;;  %v3374_v59 = vld [vmem:[#allocation11 + $0x54] sm:$0xf0] }
 0x124   : > { %1373 = vmatpush.bf16.msra.mxu0 %v2928_v33  ;;  %1346 = vmatpush.bf16.msra.mxu3 %v3020_v60  ;;  %v2971_v60 = vld [vmem:[#allocation11 + $0x148] sm:$0xf]  ;;  %v2844_v61 = vor.u32 %v3374_v59, %v2843_v56  ;;  %v3364_v56 = vld [vmem:[#allocation11 + $0xc] sm:$0xf] }
 0x125   : > { %1404 = vmatpush.bf16.msra.mxu1 %v3024_v7  ;;  %v2972_v3 = vor.u32 %v3406_v62, %v2971_v60  ;;  %v2973_v7 = vld [vmem:[#allocation11 + $0x158] sm:$0xf0] }
 0x126   : > { %v2813_v60 = vld [vmem:[#allocation11 + $0x18] sm:$0xf0] }
 0x127   : > { %1318 = vmatpush.bf16.msra.mxu2 %v2876_v14  ;;  %v2941_v62 = vld [vmem:[#allocation11 + $0x118] sm:$0xf0] }
 0x128   : > { %1374 = vmatpush.bf16.msra.mxu0 %v2912_v51  ;;  %1347 = vmatpush.bf16.msra.mxu3 %v3004_v19  ;;  %v2861_v51 = vld [vmem:[#allocation11 + $0x78] sm:$0xf0] }
 0x129   : > { %1405 = vmatpush.bf16.msra.mxu1 %v3008_v26  ;;  %v2864_v54 = vor.u32 %v3376_v49, %v2861_v51  ;;  %v2957_v49 = vld [vmem:[#allocation11 + $0x138] sm:$0xf0]  ;;  %v3366_v51 = vld [vmem:[#allocation11 + $0x14] sm:$0xf0] }
 0x12b   : > { %1319 = vmatpush.bf16.msra.mxu2 %v2860_v47  ;;  %v3400_v47 = vld [vmem:[#allocation11 + $0x12c] sm:$0xf] }
 0x12c   : > { %1375 = vmatpush.bf16.msra.mxu0 %v2896_v2 }
 0x12d   : > { %1406 = vmatpush.bf16.msra.mxu1 %v2992_v58 }
 0x12f   : > { %1320 = vmatpush.bf16.msra.mxu2 %v2844_v61  ;;  %v3396_v61 = vld [vmem:[#allocation11 + $0x10c] sm:$0xf] }
 0x130   : > { %1376 = vmatpush.bf16.msra.mxu0 %v2880_v20 }
 0x134   : > { %1377 = vmatpush.bf16.msra.mxu0 %v2864_v54  ;;  %v2939_v54 = vld [vmem:[#allocation11 + $0x108] sm:$0xf] }
 0x135   : > { %v2940_v59 = vor.u32 %v3398_v55, %v2939_v54 }
 0x177   : > { %v698_v40 = vpop.f32.mrf.mxu0 }
 0x178   : > { %v727_v45 = vpop.f32.mrf.mxu1  ;;  %v753_v0 = vmul.f32 %v3839_v38, %v698_v40 }
 0x179   : > { %v754_v5 = vmul.f32 %v3841_v39, %v727_v45  ;;  %v2987_v45 = vld [vmem:[#allocation11 + $0x168] sm:$0xf] }
 0x17a   : > { %v775_v23 = vadd.f32 %v3844_v1, %v753_v0  ;;  %v2988_v50 = vor.u32 %v3410_v48, %v2987_v45  ;;  %v2845_v0 = vld [vmem:[#allocation11 + $0x58] sm:$0xf0] }
 0x17b   : > { %v776_v27 = vadd.f32 %v3847_v6, %v754_v5  ;;  %v2848_v4 = vor.u32 %v3372_v63, %v2845_v0  ;;  %v3404_v5 = vld [vmem:[#allocation11 + $0x14c] sm:$0xf]  ;;  %v2829_v45 = vld [vmem:[#allocation11 + $0x38] sm:$0xf0] }
 0x17c   : > { %v791_v32 = vmax.f32 %v775_v23, 0.0  ;;  %1348 = vmatpush.bf16.msra.mxu3 %v2988_v50  ;;  %v2976_v15 = vor.u32 %v3404_v5, %v2973_v7  ;;  %v2811_v50 = vld [vmem:[#allocation11 + $0x8] sm:$0xf] }
 0x17d   : > { %v792_v34 = vmax.f32 %v776_v27, 0.0  ;;  %v708_v42 = vpop.f32.mrf.mxu2  ;;  %1378 = vmatpush.bf16.msra.mxu0 %v2848_v4 }
 0x17e   : > { %1407 = vmatpush.bf16.msra.mxu1 %v2976_v15 }
 0x17f   : > { %v700_v18 = vpop.f32.mrf.mxu0 }
 0x180   : > { %v755_v24 = vmul.f32 %v3839_v38, %v700_v18  ;;  %v729_v25 = vpop.f32.mrf.mxu1  ;;  %v737_v46 = vpop.f32.mrf.mxu3  ;;  %1349 = vmatpush.bf16.msra.mxu3 %v2972_v3  ;;  %v2944_v3 = vor.u32 %v3396_v61, %v2941_v62 }
 0x181   : > { %v756_v29 = vmul.f32 %v3841_v39, %v729_v25 }
 0x182   : > { %v777_v30 = vadd.f32 %v3844_v1, %v755_v24 }
 0x183   : > { %v778_v31 = vadd.f32 %v3847_v6, %v756_v29  ;;  %v2827_v29 = vld [vmem:[#allocation11 + $0x28] sm:$0xf] }
 0x184   : > { %v793_v33 = vmax.f32 %v777_v30, 0.0  ;;  %v3370_v30 = vld [vmem:[#allocation11 + $0x34] sm:$0xf0] }
 0x185   : > { %v794_v35 = vmax.f32 %v778_v31, 0.0  ;;  %v710_v20 = vpop.f32.mrf.mxu2  ;;  %v2955_v31 = vld [vmem:[#allocation11 + $0x128] sm:$0xf] }
 0x186   : > { %v3855_v36 = vpack.c.bf16 %v793_v33, %v791_v32  ;;  %v761_v32 = vmul.f32 %v3839_v38, %v708_v42  ;;  %v763_v33 = vmul.f32 %v3839_v38, %v710_v20  ;;  %v2960_v42 = vor.u32 %v3400_v47, %v2957_v49 }
 0x187   : > { %v3857_v37 = vpack.c.bf16 %v794_v35, %v792_v34  ;;  %v703_v40 = vpop.f32.mrf.mxu0  ;;  %v2828_v34 = vor.u32 %v3370_v30, %v2827_v29  ;;  %v3402_v35 = vld [vmem:[#allocation11 + $0x134] sm:$0xf0] }
 0x188   : > { %v732_v41 = vpop.f32.mrf.mxu1  ;;  %1207 = vmatmul.bf16.vlgmr.msrb.gmra.mxu2 %v3855_v36  ;;  %1265 = vmatmul.bf16.vlgmr.msrb.gmra.mxu0 %v3855_v36  ;;  %v757_v53 = vmul.f32 %v3839_v38, %v703_v40  ;;  %v739_v23 = vpop.f32.mrf.mxu3  ;;  %v3368_v40 = vld [vmem:[#allocation11 + $0x2c] sm:$0xf]  ;;  %v2956_v44 = vor.u32 %v3402_v35, %v2955_v31 }
 0x189   : > { %1236 = vmatmul.bf16.vlgmr.msrb.gmra.mxu3 %v3857_v37  ;;  %1294 = vmatmul.bf16.vlgmr.msrb.gmra.mxu1 %v3857_v37  ;;  %v758_v57 = vmul.f32 %v3841_v39, %v732_v41  ;;  %v762_v41 = vmul.f32 %v3841_v39, %v737_v46  ;;  %v764_v43 = vmul.f32 %v3841_v39, %v739_v23 }
 0x18a   : > { %v779_v9 = vadd.f32 %v3844_v1, %v757_v53  ;;  %1321 = vmatpush.bf16.msra.mxu2 %v2828_v34  ;;  %v2832_v48 = vor.u32 %v3368_v40, %v2829_v45  ;;  %1350 = vmatpush.bf16.msra.mxu3 %v2956_v44  ;;  %v2812_v53 = vor.u32 %v3366_v51, %v2811_v50 }
 0x18b   : > { %v780_v16 = vadd.f32 %v3847_v6, %v758_v57  ;;  %v783_v57 = vadd.f32 %v3844_v1, %v761_v32  ;;  %v785_v46 = vadd.f32 %v3844_v1, %v763_v33  ;;  %v784_v63 = vadd.f32 %v3847_v6, %v762_v41  ;;  %1408 = vmatpush.bf16.msra.mxu1 %v2960_v42 }
 0x18c   : > { %v795_v21 = vmax.f32 %v779_v9, 0.0  ;;  %1379 = vmatpush.bf16.msra.mxu0 %v2832_v48  ;;  %v786_v0 = vadd.f32 %v3847_v6, %v764_v43 }
 0x18d   : > { %v796_v24 = vmax.f32 %v780_v16, 0.0  ;;  %v713_v52 = vpop.f32.mrf.mxu2  ;;  %v799_v4 = vmax.f32 %v783_v57, 0.0  ;;  %v801_v5 = vmax.f32 %v785_v46, 0.0  ;;  %v800_v7 = vmax.f32 %v784_v63, 0.0 }
 0x18e   : > { %1322 = vmatpush.bf16.msra.mxu2 %v2812_v53  ;;  %1351 = vmatpush.bf16.msra.mxu3 %v2940_v59  ;;  %v802_v9 = vmax.f32 %v786_v0, 0.0 }
 0x18f   : > { %v705_v2 = vpop.f32.mrf.mxu0  ;;  %1409 = vmatpush.bf16.msra.mxu1 %v2944_v3 }
 0x190   : > { %v759_v10 = vmul.f32 %v3839_v38, %v705_v2  ;;  %v734_v14 = vpop.f32.mrf.mxu1  ;;  %v742_v58 = vpop.f32.mrf.mxu3  ;;  %v2816_v2 = vor.u32 %v3364_v56, %v2813_v60 }
 0x191   : > { %v760_v17 = vmul.f32 %v3841_v39, %v734_v14  ;;  %v812_v14 = vpack.c.bf16 %v802_v9, %v800_v7 }
 0x192   : > { %v781_v18 = vadd.f32 %v3844_v1, %v759_v10  ;;  %1380 = vmatpush.bf16.msra.mxu0 %v2816_v2  ;;  %v811_v10 = vpack.c.bf16 %v801_v5, %v799_v4 }
 0x193   : > { %v782_v19 = vadd.f32 %v3847_v6, %v760_v17  ;;  %v765_v17 = vmul.f32 %v3839_v38, %v713_v52 }
 0x194   : > { %v797_v22 = vmax.f32 %v781_v18, 0.0 }
 0x195   : > { %v798_v25 = vmax.f32 %v782_v19, 0.0  ;;  %v715_v15 = vpop.f32.mrf.mxu2  ;;  %v766_v19 = vmul.f32 %v3841_v39, %v742_v58 }
 0x196   : > { %v3871_v26 = vpack.c.bf16 %v797_v22, %v795_v21  ;;  %v767_v18 = vmul.f32 %v3839_v38, %v715_v15  ;;  %v787_v21 = vadd.f32 %v3844_v1, %v765_v17 }
 0x197   : > { %v3873_v27 = vpack.c.bf16 %v798_v25, %v796_v24  ;;  %v788_v23 = vadd.f32 %v3847_v6, %v766_v19 }
 0x198   : > { %1212 = vmatmul.bf16.gmra.mxu2 %v3871_v26  ;;  %1270 = vmatmul.bf16.gmra.mxu0 %v3871_v26  ;;  %v744_v16 = vpop.f32.mrf.mxu3  ;;  %v789_v22 = vadd.f32 %v3844_v1, %v767_v18  ;;  %v803_v25 = vmax.f32 %v787_v21, 0.0 }
 0x199   : > { %1241 = vmatmul.bf16.gmra.mxu3 %v3873_v27  ;;  %1299 = vmatmul.bf16.gmra.mxu1 %v3873_v27  ;;  %v768_v20 = vmul.f32 %v3841_v39, %v744_v16  ;;  %v804_v30 = vmax.f32 %v788_v23, 0.0 }
 0x19a   : > { %v805_v29 = vmax.f32 %v789_v22, 0.0 }
 0x19b   : > { %v790_v24 = vadd.f32 %v3847_v6, %v768_v20 }
 0x19c   : > { %v813_v32 = vpack.c.bf16 %v805_v29, %v803_v25 }
 0x19d   : > { %v806_v31 = vmax.f32 %v790_v24, 0.0 }
 0x19f   : > { %v814_v33 = vpack.c.bf16 %v806_v31, %v804_v30 }
 0x1a8   : > { %1217 = vmatmul.bf16.gmra.mxu2 %v811_v10  ;;  %1275 = vmatmul.bf16.gmra.mxu0 %v811_v10 }
 0x1a9   : > { %1246 = vmatmul.bf16.gmra.mxu3 %v812_v14  ;;  %1304 = vmatmul.bf16.gmra.mxu1 %v812_v14 }
 0x1b8   : > { %1222 = vmatmul.bf16.gmra.mxu2 %v813_v32  ;;  %1280 = vmatmul.bf16.gmra.mxu0 %v813_v32 }
 0x1b9   : > { %1251 = vmatmul.bf16.gmra.mxu3 %v814_v33  ;;  %1309 = vmatmul.bf16.gmra.mxu1 %v814_v33 }
 0x1c8   : > { %1323 = vmatmul.bf16.vlgmr.msra.gmra.mxu2 %v3855_v36  ;;  %1381 = vmatmul.bf16.vlgmr.msra.gmra.mxu0 %v3855_v36 }
 0x1c9   : > { %1352 = vmatmul.bf16.vlgmr.msra.gmra.mxu3 %v3857_v37  ;;  %1410 = vmatmul.bf16.vlgmr.msra.gmra.mxu1 %v3857_v37 }
 0x1d8   : > { %1328 = vmatmul.bf16.gmra.mxu2 %v3871_v26  ;;  %1386 = vmatmul.bf16.gmra.mxu0 %v3871_v26 }
 0x1d9   : > { %1357 = vmatmul.bf16.gmra.mxu3 %v3873_v27  ;;  %1415 = vmatmul.bf16.gmra.mxu1 %v3873_v27 }
 0x1e8   : > { %1333 = vmatmul.bf16.gmra.mxu2 %v811_v10  ;;  %1391 = vmatmul.bf16.gmra.mxu0 %v811_v10 }
 0x1e9   : > { %1362 = vmatmul.bf16.gmra.mxu3 %v812_v14  ;;  %1420 = vmatmul.bf16.gmra.mxu1 %v812_v14 }
 0x1f8   : > { %1338 = vmatmul.bf16.gmra.mxu2 %v813_v32  ;;  %1396 = vmatmul.bf16.gmra.mxu0 %v813_v32 }
 0x1f9   : > { %1367 = vmatmul.bf16.gmra.mxu3 %v814_v33  ;;  %1425 = vmatmul.bf16.gmra.mxu1 %v814_v33 }
 0x205   : > { %v1266_v38 = vpop.f32.mrf.mxu0 }
 0x206   : > { %v1295_v39 = vpop.f32.mrf.mxu1 }
 0x207   : > { %v1296_v1 = vadd.f32 %v1295_v39, %v1266_v38 }
 0x209   : > { %v1506_v40 = vmul.f32 %v1296_v1, %v1296_v1 }
 0x20b   : > { %v1208_v6 = vpop.f32.mrf.mxu2 }
 0x20c   : > { %v1237_v36 = vpop.f32.mrf.mxu3 }
 0x20d   : > { %v1238_v37 = vadd.f32 %v1237_v36, %v1208_v6  ;;  %v1268_v34 = vpop.f32.mrf.mxu0 }
 0x20e   : > { %v1297_v26 = vpop.f32.mrf.mxu1 }
 0x20f   : > { %v1298_v35 = vadd.f32 %v1297_v26, %v1268_v34  ;;  %v1505_v50 = vmul.f32 %v1238_v37, %v1238_v37 }
 0x211   : > { %v1445_v41 = vadd.f32 %v1298_v35, %v1296_v1  ;;  %v1510_v27 = vmul.f32 %v1298_v35, %v1298_v35 }
 0x213   : > { %v1550_v43 = vadd.f32 %v1510_v27, %v1506_v40  ;;  %v1210_v44 = vpop.f32.mrf.mxu2 }
 0x214   : > { %v1239_v45 = vpop.f32.mrf.mxu3 }
 0x215   : > { %v1240_v47 = vadd.f32 %v1239_v45, %v1210_v44  ;;  %v1271_v48 = vpop.f32.mrf.mxu0 }
 0x216   : > { %v1300_v49 = vpop.f32.mrf.mxu1 }
 0x217   : > { %v1432_v51 = vadd.f32 %v1240_v47, %v1238_v37  ;;  %v1509_v52 = vmul.f32 %v1240_v47, %v1240_v47  ;;  %v1301_v42 = vadd.f32 %v1300_v49, %v1271_v48 }
 0x219   : > { %v1537_v53 = vadd.f32 %v1509_v52, %v1505_v50  ;;  %v1446_v54 = vadd.f32 %v1445_v41, %v1301_v42  ;;  %v1514_v55 = vmul.f32 %v1301_v42, %v1301_v42 }
 0x21b   : > { %v1551_v56 = vadd.f32 %v1550_v43, %v1514_v55  ;;  %v1213_v57 = vpop.f32.mrf.mxu2 }
 0x21c   : > { %v1242_v46 = vpop.f32.mrf.mxu3 }
 0x21d   : > { %v1243_v58 = vadd.f32 %v1242_v46, %v1213_v57  ;;  %v1273_v59 = vpop.f32.mrf.mxu0 }
 0x21e   : > { %v1302_v60 = vpop.f32.mrf.mxu1 }
 0x21f   : > { %v1433_v61 = vadd.f32 %v1432_v51, %v1243_v58  ;;  %v1513_v62 = vmul.f32 %v1243_v58, %v1243_v58  ;;  %v1303_v63 = vadd.f32 %v1302_v60, %v1273_v59 }
 0x221   : > { %v1538_v0 = vadd.f32 %v1537_v53, %v1513_v62  ;;  %v1447_v2 = vadd.f32 %v1446_v54, %v1303_v63  ;;  %v1518_v3 = vmul.f32 %v1303_v63, %v1303_v63 }
 0x223   : > { %v1552_v4 = vadd.f32 %v1551_v56, %v1518_v3  ;;  %v1215_v5 = vpop.f32.mrf.mxu2 }
 0x224   : > { %v1244_v7 = vpop.f32.mrf.mxu3 }
 0x225   : > { %v1245_v9 = vadd.f32 %v1244_v7, %v1215_v5  ;;  %v1276_v10 = vpop.f32.mrf.mxu0 }
 0x226   : > { %v1305_v14 = vpop.f32.mrf.mxu1 }
 0x227   : > { %v1434_v15 = vadd.f32 %v1433_v61, %v1245_v9  ;;  %v1517_v16 = vmul.f32 %v1245_v9, %v1245_v9  ;;  %v1306_v17 = vadd.f32 %v1305_v14, %v1276_v10 }
 0x229   : > { %v1539_v18 = vadd.f32 %v1538_v0, %v1517_v16  ;;  %v1448_v19 = vadd.f32 %v1447_v2, %v1306_v17  ;;  %v1522_v20 = vmul.f32 %v1306_v17, %v1306_v17 }
 0x22b   : > { %v1553_v21 = vadd.f32 %v1552_v4, %v1522_v20  ;;  %v1218_v22 = vpop.f32.mrf.mxu2 }
 0x22c   : > { %v1247_v23 = vpop.f32.mrf.mxu3 }
 0x22d   : > { %v1248_v24 = vadd.f32 %v1247_v23, %v1218_v22  ;;  %v1278_v25 = vpop.f32.mrf.mxu0 }
 0x22e   : > { %v1307_v29 = vpop.f32.mrf.mxu1 }
 0x22f   : > { %v1435_v30 = vadd.f32 %v1434_v15, %v1248_v24  ;;  %v1521_v31 = vmul.f32 %v1248_v24, %v1248_v24  ;;  %v1308_v32 = vadd.f32 %v1307_v29, %v1278_v25 }
 0x231   : > { %v1540_v33 = vadd.f32 %v1539_v18, %v1521_v31  ;;  %v1449_v38 = vadd.f32 %v1448_v19, %v1308_v32  ;;  %v1526_v39 = vmul.f32 %v1308_v32, %v1308_v32 }
 0x233   : > { %v1554_v1 = vadd.f32 %v1553_v21, %v1526_v39  ;;  %v1220_v6 = vpop.f32.mrf.mxu2 }
 0x234   : > { %v1249_v36 = vpop.f32.mrf.mxu3 }
 0x235   : > { %v1250_v37 = vadd.f32 %v1249_v36, %v1220_v6  ;;  %v1281_v34 = vpop.f32.mrf.mxu0 }
 0x236   : > { %v1310_v26 = vpop.f32.mrf.mxu1 }
 0x237   : > { %v1436_v35 = vadd.f32 %v1435_v30, %v1250_v37  ;;  %v1525_v40 = vmul.f32 %v1250_v37, %v1250_v37  ;;  %v1311_v41 = vadd.f32 %v1310_v26, %v1281_v34 }
 0x239   : > { %v1541_v27 = vadd.f32 %v1540_v33, %v1525_v40  ;;  %v1450_v43 = vadd.f32 %v1449_v38, %v1311_v41  ;;  %v1530_v44 = vmul.f32 %v1311_v41, %v1311_v41 }
 0x23b   : > { %v1555_v45 = vadd.f32 %v1554_v1, %v1530_v44  ;;  %v1223_v47 = vpop.f32.mrf.mxu2 }
 0x23c   : > { %v1252_v48 = vpop.f32.mrf.mxu3 }
 0x23d   : > { %v1253_v49 = vadd.f32 %v1252_v48, %v1223_v47  ;;  %v1283_v50 = vpop.f32.mrf.mxu0 }
 0x23e   : > { %v1312_v51 = vpop.f32.mrf.mxu1 }
 0x23f   : > { %v1437_v52 = vadd.f32 %v1436_v35, %v1253_v49  ;;  %v1529_v42 = vmul.f32 %v1253_v49, %v1253_v49  ;;  %v1313_v53 = vadd.f32 %v1312_v51, %v1283_v50 }
 0x241   : > { %v1542_v54 = vadd.f32 %v1541_v27, %v1529_v42  ;;  %v1451_v55 = vadd.f32 %v1450_v43, %v1313_v53  ;;  %v1534_v56 = vmul.f32 %v1313_v53, %v1313_v53 }
 0x243   : > { %v1452_v57 = vrot.slane %v1451_v55, 4  ;;  %v1556_v46 = vadd.f32 %v1555_v45, %v1534_v56  ;;  %v1225_v58 = vpop.f32.mrf.mxu2 }
 0x244   : > { %v1254_v59 = vpop.f32.mrf.mxu3 }
 0x245   : > { %v1453_v60 = vadd.f32 %v1452_v57, %v1451_v55  ;;  %v1557_v61 = vrot.slane %v1556_v46, 4  ;;  %v1255_v62 = vadd.f32 %v1254_v59, %v1225_v58  ;;  %v1382_v63 = vpop.f32.mrf.mxu0 }
 0x246   : > { %v1411_v0 = vpop.f32.mrf.mxu1 }
 0x247   : > { %v1454_v2 = vrot.slane %v1453_v60, 2  ;;  %v1558_v3 = vadd.f32 %v1557_v61, %v1556_v46  ;;  %v1438_v4 = vadd.f32 %v1437_v52, %v1255_v62  ;;  %v1533_v5 = vmul.f32 %v1255_v62, %v1255_v62 }
 0x248   : > { %v1412_v56 = vadd.f32 %v1411_v0, %v1382_v63 }
 0x249   : > { %v1455_v7 = vadd.f32 %v1454_v2, %v1453_v60  ;;  %v1559_v9 = vrot.slane %v1558_v3, 2  ;;  %v1439_v10 = vrot.slane %v1438_v4, 4  ;;  %v1543_v14 = vadd.f32 %v1542_v54, %v1533_v5 }
 0x24a   : > { %v1508_v62 = vmul.f32 %v1412_v56, %v1412_v56 }
 0x24b   : > { %v1456_v15 = vrot.slane %v1455_v7, 1  ;;  %v1560_v16 = vadd.f32 %v1559_v9, %v1558_v3  ;;  %v1440_v17 = vadd.f32 %v1439_v10, %v1438_v4  ;;  %v1544_v18 = vrot.slane %v1543_v14, 4  ;;  %v1324_v19 = vpop.f32.mrf.mxu2 }
 0x24c   : > { %v1353_v20 = vpop.f32.mrf.mxu3 }
 0x24d   : > { %v1561_v21 = vrot.slane %v1560_v16, 1  ;;  %v1441_v22 = vrot.slane %v1440_v17, 2  ;;  %v1545_v23 = vadd.f32 %v1544_v18, %v1543_v14  ;;  %v1384_v24 = vpop.f32.mrf.mxu0  ;;  %v1457_v29 = vadd.f32 %v1456_v15, %v1455_v7 }
 0x24e   : > { %v1413_v25 = vpop.f32.mrf.mxu1  ;;  %v1354_v7 = vadd.f32 %v1353_v20, %v1324_v19 }
 0x24f   : > { %v1442_v30 = vadd.f32 %v1441_v22, %v1440_v17  ;;  %v1546_v31 = vrot.slane %v1545_v23, 2  ;;  %v1562_v32 = vadd.f32 %v1561_v21, %v1560_v16  ;;  %v1488_v39 = vrot.slane %v1457_v29, 7 }
 0x250   : > { %v1414_v55 = vadd.f32 %v1413_v25, %v1384_v24  ;;  %v1507_v24 = vmul.f32 %v1354_v7, %v1354_v7 }
 0x251   : > { %v1443_v33 = vrot.slane %v1442_v30, 1  ;;  %v1547_v38 = vadd.f32 %v1546_v31, %v1545_v23  ;;  %v1593_v34 = vrot.slane %v1562_v32, 7 }
 0x252   : > { %v1512_v46 = vmul.f32 %v1414_v55, %v1414_v55  ;;  %v1471_v2 = vadd.f32 %v1414_v55, %v1412_v56 }
 0x253   : > { %v1444_v1 = vadd.f32 %v1443_v33, %v1442_v30  ;;  %v1548_v6 = vrot.slane %v1547_v38, 1  ;;  %v1326_v36 = vpop.f32.mrf.mxu2 }
 0x254   : > { %v1355_v37 = vpop.f32.mrf.mxu3  ;;  %v1576_v14 = vadd.f32 %v1512_v46, %v1508_v62 }
 0x255   : > { %v3903_v26 = vsel %vm1491_vm12, %v1444_v1, %v1488_v39  ;;  %v1549_v35 = vadd.f32 %v1548_v6, %v1547_v38  ;;  %v1387_v40 = vpop.f32.mrf.mxu0  ;;  %v1356_v60 = vadd.f32 %v1355_v37, %v1326_v36 }
 0x256   : > { %v1416_v41 = vpop.f32.mrf.mxu1 }
 0x257   : > { %v3905_v27 = vsel %vm1491_vm12, %v1549_v35, %v1593_v34  ;;  %v1417_v57 = vadd.f32 %v1416_v41, %v1387_v40  ;;  %v1511_v18 = vmul.f32 %v1356_v60, %v1356_v60  ;;  %v1458_v30 = vadd.f32 %v1356_v60, %v1354_v7 }
 0x259   : > { %v1516_v3 = vmul.f32 %v1417_v57, %v1417_v57  ;;  %v1472_v15 = vadd.f32 %v1471_v2, %v1417_v57  ;;  %v1563_v20 = vadd.f32 %v1511_v18, %v1507_v24 }
 0x25b   : > { %v1329_v43 = vpop.f32.mrf.mxu2  ;;  %v1577_v0 = vadd.f32 %v1576_v14, %v1516_v3 }
 0x25c   : > { %v1358_v44 = vpop.f32.mrf.mxu3 }
 0x25d   : > { %v1389_v45 = vpop.f32.mrf.mxu0  ;;  %v1359_v9 = vadd.f32 %v1358_v44, %v1329_v43 }
 0x25e   : > { %v1418_v47 = vpop.f32.mrf.mxu1 }
 0x25f   : > { %v1419_v58 = vadd.f32 %v1418_v47, %v1389_v45  ;;  %v1515_v25 = vmul.f32 %v1359_v9, %v1359_v9  ;;  %v1459_v6 = vadd.f32 %v1458_v30, %v1359_v9 }
 0x261   : > { %v1520_v16 = vmul.f32 %v1419_v58, %v1419_v58  ;;  %v1473_v21 = vadd.f32 %v1472_v15, %v1419_v58  ;;  %v1564_v40 = vadd.f32 %v1563_v20, %v1515_v25 }
 0x263   : > { %v1331_v48 = vpop.f32.mrf.mxu2  ;;  %v1578_v31 = vadd.f32 %v1577_v0, %v1520_v16 }
 0x264   : > { %v1360_v49 = vpop.f32.mrf.mxu3 }
 0x265   : > { %v1392_v50 = vpop.f32.mrf.mxu0  ;;  %v1361_v63 = vadd.f32 %v1360_v49, %v1331_v48 }
 0x266   : > { %v1421_v51 = vpop.f32.mrf.mxu1 }
 0x267   : > { %v1422_v4 = vadd.f32 %v1421_v51, %v1392_v50  ;;  %v1519_v38 = vmul.f32 %v1361_v63, %v1361_v63  ;;  %v1460_v45 = vadd.f32 %v1459_v6, %v1361_v63 }
 0x269   : > { %v1524_v22 = vmul.f32 %v1422_v4, %v1422_v4  ;;  %v1474_v32 = vadd.f32 %v1473_v21, %v1422_v4  ;;  %v1565_v50 = vadd.f32 %v1564_v40, %v1519_v38 }
 0x26b   : > { %v1334_v52 = vpop.f32.mrf.mxu2  ;;  %v1579_v36 = vadd.f32 %v1578_v31, %v1524_v22 }
 0x26c   : > { %v1363_v42 = vpop.f32.mrf.mxu3 }
 0x26d   : > { %v1394_v53 = vpop.f32.mrf.mxu0  ;;  %v1364_v29 = vadd.f32 %v1363_v42, %v1334_v52 }
 0x26e   : > { %v1423_v54 = vpop.f32.mrf.mxu1 }
 0x26f   : > { %v1424_v17 = vadd.f32 %v1423_v54, %v1394_v53  ;;  %v1523_v41 = vmul.f32 %v1364_v29, %v1364_v29  ;;  %v1461_v52 = vadd.f32 %v1460_v45, %v1364_v29 }
 0x271   : > { %v1528_v33 = vmul.f32 %v1424_v17, %v1424_v17  ;;  %v1475_v37 = vadd.f32 %v1474_v32, %v1424_v17  ;;  %v1566_v55 = vadd.f32 %v1565_v50, %v1523_v41  ;;  %v1504_v41 = vld [vmem:[#allocation5] sm:$0xf] }
 0x273   : > { %v1336_v59 = vpop.f32.mrf.mxu2  ;;  %v1580_v47 = vadd.f32 %v1579_v36, %v1528_v33  ;;  %v1431_v36 = vld [vmem:[#allocation4] sm:$0xf] }
 0x274   : > { %v1365_v61 = vpop.f32.mrf.mxu3 }
 0x275   : > { %v1397_v5 = vpop.f32.mrf.mxu0  ;;  %v1366_v39 = vadd.f32 %v1365_v61, %v1336_v59 }
 0x276   : > { %v1426_v10 = vpop.f32.mrf.mxu1 }
 0x277   : > { %v1427_v23 = vadd.f32 %v1426_v10, %v1397_v5  ;;  %v1527_v51 = vmul.f32 %v1366_v39, %v1366_v39  ;;  %v1462_v57 = vadd.f32 %v1461_v52, %v1366_v39 }
 0x279   : > { %v1532_v34 = vmul.f32 %v1427_v23, %v1427_v23  ;;  %v1476_v48 = vadd.f32 %v1475_v37, %v1427_v23  ;;  %v1567_v60 = vadd.f32 %v1566_v55, %v1527_v51 }
 0x27b   : > { %v1339_v19 = vpop.f32.mrf.mxu2  ;;  %v1581_v42 = vadd.f32 %v1580_v47, %v1532_v34 }
 0x27c   : > { %v1368_v1 = vpop.f32.mrf.mxu3 }
 0x27d   : > { %v1399_v35 = vpop.f32.mrf.mxu0  ;;  %v1369_v43 = vadd.f32 %v1368_v1, %v1339_v19 }
 0x27e   : > { %v1428_v44 = vpop.f32.mrf.mxu1 }
 0x27f   : > { %v1429_v49 = vadd.f32 %v1428_v44, %v1399_v35  ;;  %v1531_v56 = vmul.f32 %v1369_v43, %v1369_v43  ;;  %v1463_v62 = vadd.f32 %v1462_v57, %v1369_v43 }
 0x281   : > { %v1477_v53 = vadd.f32 %v1476_v48, %v1429_v49  ;;  %v1536_v54 = vmul.f32 %v1429_v49, %v1429_v49  ;;  %v1568_v5 = vadd.f32 %v1567_v60, %v1531_v56 }
 0x283   : > { %v1478_v46 = vrot.slane %v1477_v53, 4  ;;  %v1582_v58 = vadd.f32 %v1581_v42, %v1536_v54  ;;  %v1341_v59 = vpop.f32.mrf.mxu2 }
 0x284   : > { %v1370_v61 = vpop.f32.mrf.mxu3 }
 0x285   : > { %v1479_v2 = vadd.f32 %v1478_v46, %v1477_v53  ;;  %v1583_v3 = vrot.slane %v1582_v58, 4  ;;  %v1371_v4 = vadd.f32 %v1370_v61, %v1341_v59 }
 0x287   : > { %v1480_v7 = vrot.slane %v1479_v2, 2  ;;  %v1584_v9 = vadd.f32 %v1583_v3, %v1582_v58  ;;  %v1464_v10 = vadd.f32 %v1463_v62, %v1371_v4  ;;  %v1535_v14 = vmul.f32 %v1371_v4, %v1371_v4 }
 0x289   : > { %v1481_v15 = vadd.f32 %v1480_v7, %v1479_v2  ;;  %v1585_v16 = vrot.slane %v1584_v9, 2  ;;  %v1465_v17 = vrot.slane %v1464_v10, 4  ;;  %v1569_v18 = vadd.f32 %v1568_v5, %v1535_v14 }
 0x28b   : > { %v1586_v63 = vadd.f32 %v1585_v16, %v1584_v9  ;;  %v1466_v0 = vadd.f32 %v1465_v17, %v1464_v10  ;;  %v1570_v21 = vrot.slane %v1569_v18, 4  ;;  %v1482_v22 = vrot.slane %v1481_v15, 1 }
 0x28d   : > { %v1467_v23 = vrot.slane %v1466_v0, 2  ;;  %v1571_v24 = vadd.f32 %v1570_v21, %v1569_v18  ;;  %v1587_v25 = vrot.slane %v1586_v63, 1  ;;  %v1483_v31 = vadd.f32 %v1482_v22, %v1481_v15 }
 0x28f   : > { %v1468_v29 = vadd.f32 %v1467_v23, %v1466_v0  ;;  %v1572_v30 = vrot.slane %v1571_v24, 2  ;;  %v1588_v19 = vadd.f32 %v1587_v25, %v1586_v63  ;;  %v1490_v39 = vrot.slane %v1483_v31, 5 }
 0x291   : > { %v1469_v32 = vrot.slane %v1468_v29, 1  ;;  %v1573_v33 = vadd.f32 %v1572_v30, %v1571_v24  ;;  %v1595_v37 = vrot.slane %v1588_v19, 5 }
 0x293   : > { %v1470_v20 = vadd.f32 %v1469_v32, %v1468_v29  ;;  %v1574_v38 = vrot.slane %v1573_v33, 1 }
 0x295   : > { %v1489_v1 = vrot.slane %v1470_v20, 6  ;;  %v1575_v6 = vadd.f32 %v1574_v38, %v1573_v33 }
 0x297   : > { %v1494_v34 = vsel %vm1493_vm13, %v1489_v1, %v1490_v39  ;;  %v1594_v35 = vrot.slane %v1575_v6, 6 }
 0x298   : > { %v1496_v40 = vsel %vm1495_vm14, %v3903_v26, %v1494_v34 }
 0x299   : > { %v1498_v43 = vadd.f32 %v1496_v40, %v1431_v36  ;;  %v1597_v44 = vsel %vm1493_vm13, %v1594_v35, %v1595_v37 }
 0x29a   : > { %v1598_v45 = vsel %vm1495_vm14, %v3905_v27, %v1597_v44 }
 0x29b   : > { %1503 = vst.msk [vmem:[#allocation4] sm:$0xf] %vm1501_vm15, %v1498_v43  ;;  %v1600_v47 = vadd.f32 %v1598_v45, %v1504_v41 }
 0x29d   : > { %1601 = vst.msk [vmem:[#allocation5] sm:$0xf] %vm1501_vm15, %v1600_v47 }
 0x29e PF: > { %p3057_p10 = scmp.ne.s32.totalorder %s3605_s11, 2 }
 0x29f   : > { %s2632_s28 = sld [smem:[#allocation10]] (!%p3057_p10) }
 0x2a0   : > { %1605 = sbr.rel (%p3057_p10) target bundleno = 1220 (0x4c4), region = 80 }
 0x2a5   : > { %v3076_v48 = vld [vmem:[%s4276_s1 + $0x20] sm:$0xf]  ;;  %v3432_v28 = vld [vmem:[%s4276_s1 + $0x24] sm:$0x10]  ;;  %vm1685_vm0 = vcmask 1044480   ;;  %vm1672_vm1 = vcmask 343040  }
 0x2a6   : > { %v3077_v26 = vor.u32 %v3432_v28, %v3076_v48  ;;  %v3431_v27 = vld [vmem:[%s4276_s1 + $0x24] sm:$0xf]  ;;  %v3078_v49 = vld [vmem:[%s4276_s1 + $0x28] sm:$0x10]  ;;  %v3068_v50 = vld [vmem:[%s4276_s1 + $0x10] sm:$0xf] }
 0x2a7   : > { %v3081_v51 = vor.u32 %v3431_v27, %v3078_v49  ;;  %v3430_v52 = vld [vmem:[%s4276_s1 + $0x14] sm:$0xf0]  ;;  %v3429_v42 = vld [vmem:[%s4276_s1 + $0x14] sm:$0xf]  ;;  %v3070_v53 = vld [vmem:[%s4276_s1 + $0x18] sm:$0xf0] }
 0x2a8   : > { %v1687_v54 = vsel %vm1685_vm0, %v3077_v26, 0  ;;  %v3069_v56 = vor.u32 %v3430_v52, %v3068_v50  ;;  %v3073_v57 = vor.u32 %v3429_v42, %v3070_v53  ;;  %v3060_v46 = vld [vmem:[%s4276_s1] sm:$0xf]  ;;  %v3428_v58 = vld [vmem:[%s4276_s1 + $0x4] sm:$0xf0]  ;;  %vm2642_vm6 = vcmask 7168  }
 0x2a9   : > { %1697 = vmatpush.bf16.msra.mxu0 %v1687_v54  ;;  %v1690_v55 = vsel %vm1685_vm0, %v3081_v51, 0  ;;  %3509 = vmatpush.bf16.msra.mxu2 %v1687_v54  ;;  %v3427_v59 = vld [vmem:[%s4276_s1 + $0x4] sm:$0xf]  ;;  %v3062_v60 = vld [vmem:[%s4276_s1 + $0x8] sm:$0xf0]  ;;  %v3061_v4 = vor.u32 %v3428_v58, %v3060_v46 }
 0x2aa   : > { %1726 = vmatpush.bf16.msra.mxu1 %v1690_v55  ;;  %3512 = vmatpush.bf16.msra.mxu3 %v1690_v55  ;;  %v3204_v61 = vld [vmem:[#allocation11 + $0xe0] sm:$0xf]  ;;  %v3463_v62 = vld [vmem:[#allocation11 + $0xec] sm:$0xf0]  ;;  %v3065_v5 = vor.u32 %v3427_v59, %v3062_v60  ;;  %v3461_v7 = vld [vmem:[#allocation11 + $0xe4] sm:$0xf] }
 0x2ab   : > { %v3332_v2 = vld [vmem:[#allocation11 + $0x1e0] sm:$0xf]  ;;  %v3495_v3 = vld [vmem:[#allocation11 + $0x1ec] sm:$0xf0]  ;;  %v3206_v9 = vld [vmem:[#allocation11 + $0xf0] sm:$0xf0]  ;;  %v3205_v10 = vor.u32 %v3463_v62, %v3204_v61 }
 0x2ac   : > { %v3333_v14 = vor.u32 %v3495_v3, %v3332_v2  ;;  %v3493_v15 = vld [vmem:[#allocation11 + $0x1e4] sm:$0xf]  ;;  %v3334_v16 = vld [vmem:[#allocation11 + $0x1f0] sm:$0xf0]  ;;  %v3188_v17 = vld [vmem:[#allocation11 + $0xc0] sm:$0xf]  ;;  %v3209_v21 = vor.u32 %v3461_v7, %v3206_v9 }
 0x2ad   : > { %1698 = vmatpush.bf16.msra.mxu0 %v3069_v56  ;;  %3510 = vmatpush.bf16.msra.mxu2 %v3069_v56  ;;  %v3459_v18 = vld [vmem:[#allocation11 + $0xcc] sm:$0xf0]  ;;  %v3316_v63 = vld [vmem:[#allocation11 + $0x1c0] sm:$0xf]  ;;  %v3337_v22 = vor.u32 %v3493_v15, %v3334_v16  ;;  %v3457_v23 = vld [vmem:[#allocation11 + $0xc4] sm:$0xf] }
 0x2ae   : > { %1727 = vmatpush.bf16.msra.mxu1 %v3073_v57  ;;  %3513 = vmatpush.bf16.msra.mxu3 %v3073_v57  ;;  %v3491_v0 = vld [vmem:[#allocation11 + $0x1cc] sm:$0xf0]  ;;  %v3190_v24 = vld [vmem:[#allocation11 + $0xd0] sm:$0xf0]  ;;  %v3189_v25 = vor.u32 %v3459_v18, %v3188_v17  ;;  %v3489_v30 = vld [vmem:[#allocation11 + $0x1c4] sm:$0xf] }
 0x2af   : > { %v3317_v29 = vor.u32 %v3491_v0, %v3316_v63  ;;  %v3318_v31 = vld [vmem:[#allocation11 + $0x1d0] sm:$0xf0]  ;;  %v3172_v32 = vld [vmem:[#allocation11 + $0xa0] sm:$0xf]  ;;  %v3455_v33 = vld [vmem:[#allocation11 + $0xac] sm:$0xf0]  ;;  %v3193_v38 = vor.u32 %v3457_v23, %v3190_v24 }
 0x2b0   : > { %v3300_v19 = vld [vmem:[#allocation11 + $0x1a0] sm:$0xf]  ;;  %v3487_v20 = vld [vmem:[#allocation11 + $0x1ac] sm:$0xf0]  ;;  %v3321_v39 = vor.u32 %v3489_v30, %v3318_v31  ;;  %v3453_v1 = vld [vmem:[#allocation11 + $0xa4] sm:$0xf]  ;;  %v3173_v36 = vor.u32 %v3455_v33, %v3172_v32 }
 0x2b1   : > { %1699 = vmatpush.bf16.msra.mxu0 %v3061_v4  ;;  %3511 = vmatpush.bf16.msra.mxu2 %v3061_v4  ;;  %v3174_v6 = vld [vmem:[#allocation11 + $0xb0] sm:$0xf0]  ;;  %v3301_v37 = vor.u32 %v3487_v20, %v3300_v19  ;;  %v3485_v34 = vld [vmem:[#allocation11 + $0x1a4] sm:$0xf]  ;;  %v3156_v40 = vld [vmem:[#allocation11 + $0x80] sm:$0xf] }
 0x2b2   : > { %1728 = vmatpush.bf16.msra.mxu1 %v3065_v5  ;;  %3514 = vmatpush.bf16.msra.mxu3 %v3065_v5  ;;  %v3302_v35 = vld [vmem:[#allocation11 + $0x1b0] sm:$0xf0]  ;;  %v3451_v41 = vld [vmem:[#allocation11 + $0x8c] sm:$0xf0]  ;;  %v3284_v43 = vld [vmem:[#allocation11 + $0x180] sm:$0xf] }
 0x2b3   : > { %v3483_v44 = vld [vmem:[#allocation11 + $0x18c] sm:$0xf0]  ;;  %v3449_v45 = vld [vmem:[#allocation11 + $0x84] sm:$0xf]  ;;  %v3157_v47 = vor.u32 %v3451_v41, %v3156_v40  ;;  %v3158_v28 = vld [vmem:[#allocation11 + $0x90] sm:$0xf0] }
 0x2b4   : > { %3082 = vmatmul.msk.bf16.vlgmr.msra.gmra.mxu0 %vm1672_vm1, %v3715_v8  ;;  %3084 = vmatmul.msk.bf16.vlgmr.msra.gmra.mxu2 %vm1672_vm1, %v3725_v12  ;;  %v3285_v48 = vor.u32 %v3483_v44, %v3284_v43  ;;  %v3481_v26 = vld [vmem:[#allocation11 + $0x184] sm:$0xf]  ;;  %v3286_v27 = vld [vmem:[#allocation11 + $0x190] sm:$0xf0]  ;;  %v3161_v49 = vor.u32 %v3449_v45, %v3158_v28  ;;  %v3140_v51 = vld [vmem:[#allocation11 + $0x60] sm:$0xf] }
 0x2b5   : > { %2202 = vmatpush.bf16.msrb.mxu2 %v3205_v10  ;;  %3086 = vmatmul.msk.bf16.vlgmr.msra.gmra.mxu1 %vm1672_vm1, %v3715_v8  ;;  %v3177_v8 = vor.u32 %v3453_v1, %v3174_v6  ;;  %v3289_v50 = vor.u32 %v3481_v26, %v3286_v27  ;;  %v3447_v52 = vld [vmem:[#allocation11 + $0x6c] sm:$0xf0]  ;;  %v3268_v53 = vld [vmem:[#allocation11 + $0x160] sm:$0xf]  ;;  %v3445_v56 = vld [vmem:[#allocation11 + $0x64] sm:$0xf] }
 0x2b6   : > { %2231 = vmatpush.bf16.msrb.mxu3 %v3333_v14  ;;  %2260 = vmatpush.bf16.msrb.mxu0 %v3209_v21  ;;  %v3141_v42 = vor.u32 %v3447_v52, %v3140_v51  ;;  %v3479_v54 = vld [vmem:[#allocation11 + $0x16c] sm:$0xf0]  ;;  %v3142_v57 = vld [vmem:[#allocation11 + $0x70] sm:$0xf0]  ;;  %v3477_v58 = vld [vmem:[#allocation11 + $0x164] sm:$0xf] }
 0x2b7   : > { %3088 = vmatmul.msk.bf16.vlgmr.msra.gmra.mxu3 %vm1672_vm1, %v3725_v12  ;;  %2289 = vmatpush.bf16.msrb.mxu1 %v3337_v22  ;;  %v3305_v12 = vor.u32 %v3485_v34, %v3302_v35  ;;  %v3269_v55 = vor.u32 %v3479_v54, %v3268_v53  ;;  %v3145_v46 = vor.u32 %v3445_v56, %v3142_v57  ;;  %v3270_v59 = vld [vmem:[#allocation11 + $0x170] sm:$0xf0]  ;;  %v3124_v61 = vld [vmem:[#allocation11 + $0x40] sm:$0xf]  ;;  %v3443_v62 = vld [vmem:[#allocation11 + $0x4c] sm:$0xf0] }
 0x2b8   : > { %v3273_v60 = vor.u32 %v3477_v58, %v3270_v59  ;;  %v3125_v2 = vor.u32 %v3443_v62, %v3124_v61  ;;  %v3441_v3 = vld [vmem:[#allocation11 + $0x44] sm:$0xf]  ;;  %v3126_v4 = vld [vmem:[#allocation11 + $0x50] sm:$0xf0]  ;;  %v3108_v15 = vld [vmem:[#allocation11 + $0x20] sm:$0xf] }
 0x2b9   : > { %2203 = vmatpush.bf16.msrb.mxu2 %v3189_v25  ;;  %v3129_v7 = vor.u32 %v3441_v3, %v3126_v4  ;;  %v3473_v9 = vld [vmem:[#allocation11 + $0x144] sm:$0xf]  ;;  %v3254_v10 = vld [vmem:[#allocation11 + $0x150] sm:$0xf0]  ;;  %v3439_v16 = vld [vmem:[#allocation11 + $0x2c] sm:$0xf0] }
 0x2ba   : > { %2232 = vmatpush.bf16.msrb.mxu3 %v3317_v29  ;;  %2261 = vmatpush.bf16.msrb.mxu0 %v3193_v38  ;;  %v3257_v14 = vor.u32 %v3473_v9, %v3254_v10  ;;  %v3236_v17 = vld [vmem:[#allocation11 + $0x120] sm:$0xf]  ;;  %v3109_v18 = vor.u32 %v3439_v16, %v3108_v15  ;;  %v3471_v63 = vld [vmem:[#allocation11 + $0x12c] sm:$0xf0]  ;;  %v3437_v0 = vld [vmem:[#allocation11 + $0x24] sm:$0xf] }
 0x2bb   : > { %2290 = vmatpush.bf16.msrb.mxu1 %v3321_v39  ;;  %v3110_v21 = vld [vmem:[#allocation11 + $0x30] sm:$0xf0]  ;;  %v3237_v22 = vor.u32 %v3471_v63, %v3236_v17  ;;  %v3469_v24 = vld [vmem:[#allocation11 + $0x124] sm:$0xf]  ;;  %v3092_v30 = vld [vmem:[#allocation11] sm:$0xf] }
 0x2bc   : > { %v3113_v23 = vor.u32 %v3437_v0, %v3110_v21  ;;  %v3238_v25 = vld [vmem:[#allocation11 + $0x130] sm:$0xf0]  ;;  %v3435_v31 = vld [vmem:[#allocation11 + $0xc] sm:$0xf0]  ;;  %v3220_v32 = vld [vmem:[#allocation11 + $0x100] sm:$0xf] }
 0x2bd   : > { %2204 = vmatpush.bf16.msrb.mxu2 %v3173_v36  ;;  %v3241_v29 = vor.u32 %v3469_v24, %v3238_v25  ;;  %v3093_v33 = vor.u32 %v3435_v31, %v3092_v30  ;;  %v3467_v19 = vld [vmem:[#allocation11 + $0x10c] sm:$0xf0]  ;;  %v3433_v20 = vld [vmem:[#allocation11 + $0x4] sm:$0xf]  ;;  %v3094_v38 = vld [vmem:[#allocation11 + $0x10] sm:$0xf0] }
 0x2be   : > { %2233 = vmatpush.bf16.msrb.mxu3 %v3301_v37  ;;  %2262 = vmatpush.bf16.msrb.mxu0 %v3177_v8  ;;  %v3221_v39 = vor.u32 %v3467_v19, %v3220_v32  ;;  %v3097_v1 = vor.u32 %v3433_v20, %v3094_v38  ;;  %v3465_v6 = vld [vmem:[#allocation11 + $0x104] sm:$0xf]  ;;  %v3222_v36 = vld [vmem:[#allocation11 + $0x110] sm:$0xf0]  ;;  %v3212_v34 = vld [vmem:[#allocation11 + $0xe8] sm:$0xf] }
 0x2bf   : > { %2291 = vmatpush.bf16.msrb.mxu1 %v3305_v12  ;;  %v3225_v37 = vor.u32 %v3465_v6, %v3222_v36  ;;  %v3464_v35 = vld [vmem:[#allocation11 + $0xf4] sm:$0xf0]  ;;  %v3340_v40 = vld [vmem:[#allocation11 + $0x1e8] sm:$0xf]  ;;  %v1750_v8 = vld [vmem:[#allocation6] sm:$0x3] }
 0x2c0   : > { %v3213_v41 = vor.u32 %v3464_v35, %v3212_v34  ;;  %v3496_v43 = vld [vmem:[#allocation11 + $0x1f4] sm:$0xf0]  ;;  %v3963_v12 = vperm.slane %v1750_v8, 0  ;;  %v3965_v45 = vperm.slane %v1750_v8, 1  ;;  %v3196_v28 = vld [vmem:[#allocation11 + $0xc8] sm:$0xf] }
 0x2c1   : > { %2205 = vmatpush.bf16.msrb.mxu2 %v3157_v47  ;;  %v3341_v44 = vor.u32 %v3496_v43, %v3340_v40  ;;  %v3460_v26 = vld [vmem:[#allocation11 + $0xd4] sm:$0xf0]  ;;  %v3324_v27 = vld [vmem:[#allocation11 + $0x1c8] sm:$0xf]  ;;  %v3462_v52 = vld [vmem:[#allocation11 + $0xec] sm:$0xf] }
 0x2c2   : > { %2234 = vmatpush.bf16.msrb.mxu3 %v3285_v48  ;;  %2263 = vmatpush.bf16.msrb.mxu0 %v3161_v49  ;;  %v1772_v48 = vld [vmem:[#allocation7] sm:$0x3]  ;;  %v3492_v51 = vld [vmem:[#allocation11 + $0x1d4] sm:$0xf0]  ;;  %v3342_v56 = vld [vmem:[#allocation11 + $0x1f8] sm:$0xf0] }
 0x2c3   : > { %2292 = vmatpush.bf16.msrb.mxu1 %v3289_v50  ;;  %v3197_v50 = vor.u32 %v3460_v26, %v3196_v28  ;;  %v3325_v53 = vor.u32 %v3492_v51, %v3324_v27  ;;  %v3180_v57 = vld [vmem:[#allocation11 + $0xa8] sm:$0xf]  ;;  %v3456_v58 = vld [vmem:[#allocation11 + $0xb4] sm:$0xf0]  ;;  %v3968_v4 = vperm.slane %v1772_v48, 0 }
 0x2c4   : > { %3083 = vmatmul.msk.bf16.gmra.mxu0 %vm1672_vm1, %v3723_v11  ;;  %3085 = vmatmul.msk.bf16.gmra.mxu2 %vm1672_vm1, %v3727_v13  ;;  %v3308_v59 = vld [vmem:[#allocation11 + $0x1a8] sm:$0xf]  ;;  %v3181_v61 = vor.u32 %v3456_v58, %v3180_v57  ;;  %v3452_v16 = vld [vmem:[#allocation11 + $0x94] sm:$0xf0]  ;;  %v3454_v0 = vld [vmem:[#allocation11 + $0xac] sm:$0xf] }
 0x2c5   : > { %3087 = vmatmul.msk.bf16.gmra.mxu1 %vm1672_vm1, %v3723_v11  ;;  %2206 = vmatpush.bf16.msrb.mxu2 %v3141_v42  ;;  %v3252_v11 = vld [vmem:[#allocation11 + $0x140] sm:$0xf]  ;;  %v3214_v42 = vld [vmem:[#allocation11 + $0xf8] sm:$0xf0]  ;;  %v3164_v9 = vld [vmem:[#allocation11 + $0x88] sm:$0xf] }
 0x2c6   : > { %2235 = vmatpush.bf16.msrb.mxu3 %v3269_v55  ;;  %2264 = vmatpush.bf16.msrb.mxu0 %v3145_v46  ;;  %v3217_v54 = vor.u32 %v3462_v52, %v3214_v42  ;;  %v3494_v55 = vld [vmem:[#allocation11 + $0x1ec] sm:$0xf]  ;;  %v3292_v17 = vld [vmem:[#allocation11 + $0x188] sm:$0xf]  ;;  %v3484_v63 = vld [vmem:[#allocation11 + $0x194] sm:$0xf0] }
 0x2c7   : > { %3089 = vmatmul.msk.bf16.gmra.mxu3 %vm1672_vm1, %v3727_v13  ;;  %v3475_v13 = vld [vmem:[#allocation11 + $0x14c] sm:$0xf0]  ;;  %2293 = vmatpush.bf16.msrb.mxu1 %v3273_v60  ;;  %v3345_v46 = vor.u32 %v3494_v55, %v3342_v56  ;;  %v3488_v60 = vld [vmem:[#allocation11 + $0x1b4] sm:$0xf0]  ;;  %v3182_v21 = vld [vmem:[#allocation11 + $0xb8] sm:$0xf0] }
 0x2c8   : > { %v3253_v5 = vor.u32 %v3475_v13, %v3252_v11  ;;  %v3309_v62 = vor.u32 %v3488_v60, %v3308_v59  ;;  %v3458_v11 = vld [vmem:[#allocation11 + $0xcc] sm:$0xf]  ;;  %v3185_v24 = vor.u32 %v3454_v0, %v3182_v21  ;;  %v3448_v8 = vld [vmem:[#allocation11 + $0x74] sm:$0xf0] }
 0x2c9   : > { %2207 = vmatpush.bf16.msrb.mxu2 %v3125_v2  ;;  %v3198_v2 = vld [vmem:[#allocation11 + $0xd8] sm:$0xf0]  ;;  %v3490_v13 = vld [vmem:[#allocation11 + $0x1cc] sm:$0xf]  ;;  %v3480_v26 = vld [vmem:[#allocation11 + $0x174] sm:$0xf0] }
 0x2ca   : > { %2236 = vmatpush.bf16.msrb.mxu3 %v3253_v5  ;;  %2265 = vmatpush.bf16.msrb.mxu0 %v3129_v7  ;;  %v3201_v5 = vor.u32 %v3458_v11, %v3198_v2  ;;  %v3326_v7 = vld [vmem:[#allocation11 + $0x1d8] sm:$0xf0]  ;;  %v3486_v25 = vld [vmem:[#allocation11 + $0x1ac] sm:$0xf]  ;;  %v3444_v57 = vld [vmem:[#allocation11 + $0x54] sm:$0xf0] }
 0x2cb   : > { %2294 = vmatpush.bf16.msrb.mxu1 %v3257_v14  ;;  %v3971_v14 = vperm.slane %v1772_v48, 1  ;;  %v3329_v15 = vor.u32 %v3490_v13, %v3326_v7  ;;  %v3450_v27 = vld [vmem:[#allocation11 + $0x8c] sm:$0xf]  ;;  %v3476_v59 = vld [vmem:[#allocation11 + $0x154] sm:$0xf0] }
 0x2cc   : > { %v3482_v51 = vld [vmem:[#allocation11 + $0x18c] sm:$0xf] }
 0x2cd   : > { %2208 = vmatpush.bf16.msrb.mxu2 %v3109_v18  ;;  %v3165_v18 = vor.u32 %v3452_v16, %v3164_v9  ;;  %v3446_v60 = vld [vmem:[#allocation11 + $0x6c] sm:$0xf] }
 0x2ce   : > { %2237 = vmatpush.bf16.msrb.mxu3 %v3237_v22  ;;  %2266 = vmatpush.bf16.msrb.mxu0 %v3113_v23  ;;  %v3293_v23 = vor.u32 %v3484_v63, %v3292_v17  ;;  %v3478_v13 = vld [vmem:[#allocation11 + $0x16c] sm:$0xf] }
 0x2cf   : > { %2295 = vmatpush.bf16.msrb.mxu1 %v3241_v29  ;;  %v3310_v29 = vld [vmem:[#allocation11 + $0x1b8] sm:$0xf0] }
 0x2d1   : > { %2209 = vmatpush.bf16.msrb.mxu2 %v3093_v33  ;;  %v3313_v33 = vor.u32 %v3486_v25, %v3310_v29 }
 0x2d2   : > { %2238 = vmatpush.bf16.msrb.mxu3 %v3221_v39  ;;  %2267 = vmatpush.bf16.msrb.mxu0 %v3097_v1 }
 0x2d3   : > { %2296 = vmatpush.bf16.msrb.mxu1 %v3225_v37 }
 0x2d5   : > { %2318 = vmatpush.bf16.msra.mxu2 %v3213_v41 }
 0x2d6   : > { %2347 = vmatpush.bf16.msra.mxu3 %v3341_v44  ;;  %2376 = vmatpush.bf16.msra.mxu0 %v3217_v54  ;;  %v3148_v44 = vld [vmem:[#allocation11 + $0x68] sm:$0xf] }
 0x2d7   : > { %2405 = vmatpush.bf16.msra.mxu1 %v3345_v46  ;;  %v3149_v28 = vor.u32 %v3448_v8, %v3148_v44  ;;  %v3132_v54 = vld [vmem:[#allocation11 + $0x48] sm:$0xf]  ;;  %v3262_v44 = vld [vmem:[#allocation11 + $0x158] sm:$0xf0] }
 0x2d8   : > { %v3260_v46 = vld [vmem:[#allocation11 + $0x148] sm:$0xf]  ;;  %v3133_v58 = vor.u32 %v3444_v57, %v3132_v54  ;;  %v3470_v54 = vld [vmem:[#allocation11 + $0x12c] sm:$0xf] }
 0x2d9   : > { %2319 = vmatpush.bf16.msra.mxu2 %v3197_v50  ;;  %v3166_v50 = vld [vmem:[#allocation11 + $0x98] sm:$0xf0]  ;;  %v3261_v11 = vor.u32 %v3476_v59, %v3260_v46  ;;  %v3100_v8 = vld [vmem:[#allocation11 + $0x8] sm:$0xf]  ;;  %v3434_v59 = vld [vmem:[#allocation11 + $0xc] sm:$0xf] }
 0x2da   : > { %2348 = vmatpush.bf16.msra.mxu3 %v3325_v53  ;;  %2377 = vmatpush.bf16.msra.mxu0 %v3201_v5  ;;  %v3169_v42 = vor.u32 %v3450_v27, %v3166_v50  ;;  %v3294_v53 = vld [vmem:[#allocation11 + $0x198] sm:$0xf0]  ;;  %v3228_v27 = vld [vmem:[#allocation11 + $0x108] sm:$0xf]  ;;  %v3438_v50 = vld [vmem:[#allocation11 + $0x2c] sm:$0xf] }
 0x2db   : > { %2406 = vmatpush.bf16.msra.mxu1 %v3329_v15  ;;  %v3297_v56 = vor.u32 %v3482_v51, %v3294_v53  ;;  %v3118_v53 = vld [vmem:[#allocation11 + $0x38] sm:$0xf0] }
 0x2dc   : > { %v3121_v46 = vor.u32 %v3438_v50, %v3118_v53 }
 0x2dd   : > { %2320 = vmatpush.bf16.msra.mxu2 %v3181_v61  ;;  %v3150_v61 = vld [vmem:[#allocation11 + $0x78] sm:$0xf0] }
 0x2de   : > { %2349 = vmatpush.bf16.msra.mxu3 %v3309_v62  ;;  %2378 = vmatpush.bf16.msra.mxu0 %v3185_v24  ;;  %v3153_v2 = vor.u32 %v3446_v60, %v3150_v61  ;;  %v3102_v60 = vld [vmem:[#allocation11 + $0x18] sm:$0xf0]  ;;  %v3466_v61 = vld [vmem:[#allocation11 + $0x10c] sm:$0xf] }
 0x2df   : > { %2407 = vmatpush.bf16.msra.mxu1 %v3313_v33 }
 0x2e1   : > { %2321 = vmatpush.bf16.msra.mxu2 %v3165_v18 }
 0x2e2   : > { %2350 = vmatpush.bf16.msra.mxu3 %v3293_v23  ;;  %2379 = vmatpush.bf16.msra.mxu0 %v3169_v42 }
 0x2e3   : > { %2408 = vmatpush.bf16.msra.mxu1 %v3297_v56 }
 0x2e5   : > { %2322 = vmatpush.bf16.msra.mxu2 %v3149_v28 }
 0x2e6   : > { %2380 = vmatpush.bf16.msra.mxu0 %v3153_v2 }
 0x2e9   : > { %2323 = vmatpush.bf16.msra.mxu2 %v3133_v58 }
 0x331   : > { %v1701_v47 = vpop.f32.mrf.mxu0 }
 0x332   : > { %v1730_v49 = vpop.f32.mrf.mxu1  ;;  %v1756_v3 = vmul.f32 %v3963_v12, %v1701_v47  ;;  %v3276_v47 = vld [vmem:[#allocation11 + $0x168] sm:$0xf] }
 0x333   : > { %v1757_v10 = vmul.f32 %v3965_v45, %v1730_v49  ;;  %v3277_v49 = vor.u32 %v3480_v26, %v3276_v47  ;;  %v3436_v47 = vld [vmem:[#allocation11 + $0x14] sm:$0xf0] }
 0x334   : > { %v1778_v30 = vadd.f32 %v3968_v4, %v1756_v3  ;;  %v3278_v3 = vld [vmem:[#allocation11 + $0x178] sm:$0xf0]  ;;  %v3101_v26 = vor.u32 %v3436_v47, %v3100_v8 }
 0x335   : > { %v1779_v19 = vadd.f32 %v3971_v14, %v1757_v10  ;;  %2351 = vmatpush.bf16.msra.mxu3 %v3277_v49  ;;  %v3281_v10 = vor.u32 %v3478_v13, %v3278_v3  ;;  %v3468_v49 = vld [vmem:[#allocation11 + $0x114] sm:$0xf0]  ;;  %v3105_v13 = vor.u32 %v3434_v59, %v3102_v60 }
 0x336   : > { %v1794_v1 = vmax.f32 %v1778_v30, 0.0  ;;  %v3116_v30 = vld [vmem:[#allocation11 + $0x28] sm:$0xf]  ;;  %v3229_v42 = vor.u32 %v3468_v49, %v3228_v27 }
 0x337   : > { %v1795_v36 = vmax.f32 %v1779_v19, 0.0  ;;  %v1711_v43 = vpop.f32.mrf.mxu2  ;;  %2409 = vmatpush.bf16.msra.mxu1 %v3281_v10 }
 0x338   : > { %v1764_v33 = vmul.f32 %v3963_v12, %v1711_v43 }
 0x339   : > { %v1703_v22 = vpop.f32.mrf.mxu0  ;;  %2352 = vmatpush.bf16.msra.mxu3 %v3261_v11 }
 0x33a   : > { %v1758_v31 = vmul.f32 %v3963_v12, %v1703_v22  ;;  %v1732_v32 = vpop.f32.mrf.mxu1  ;;  %v1740_v48 = vpop.f32.mrf.mxu3  ;;  %v1786_v51 = vadd.f32 %v3968_v4, %v1764_v33 }
 0x33b   : > { %v1759_v20 = vmul.f32 %v3965_v45, %v1732_v32  ;;  %v3244_v32 = vld [vmem:[#allocation11 + $0x128] sm:$0xf] }
 0x33c   : > { %v1780_v38 = vadd.f32 %v3968_v4, %v1758_v31  ;;  %v3440_v31 = vld [vmem:[#allocation11 + $0x34] sm:$0xf0]  ;;  %v1802_v11 = vmax.f32 %v1786_v51, 0.0 }
 0x33d   : > { %v1781_v39 = vadd.f32 %v3971_v14, %v1759_v20  ;;  %v3117_v20 = vor.u32 %v3440_v31, %v3116_v30 }
 0x33e   : > { %v1796_v6 = vmax.f32 %v1780_v38, 0.0  ;;  %v3472_v38 = vld [vmem:[#allocation11 + $0x134] sm:$0xf0] }
 0x33f   : > { %v1797_v37 = vmax.f32 %v1781_v39, 0.0  ;;  %v1713_v63 = vpop.f32.mrf.mxu2  ;;  %v3442_v39 = vld [vmem:[#allocation11 + $0x4c] sm:$0xf]  ;;  %2324 = vmatpush.bf16.msra.mxu2 %v3117_v20 }
 0x340   : > { %v3979_v34 = vpack.c.bf16 %v1796_v6, %v1794_v1  ;;  %v1766_v19 = vmul.f32 %v3963_v12, %v1713_v63  ;;  %v1765_v1 = vmul.f32 %v3965_v45, %v1740_v48 }
 0x341   : > { %v3981_v35 = vpack.c.bf16 %v1797_v37, %v1795_v36  ;;  %v1706_v40 = vpop.f32.mrf.mxu0  ;;  %v3245_v36 = vor.u32 %v3472_v38, %v3244_v32  ;;  %v3134_v37 = vld [vmem:[#allocation11 + $0x58] sm:$0xf0]  ;;  %v1611_v38 = vld [vmem:[#allocation5] sm:$0xf] }
 0x342   : > { %v1735_v41 = vpop.f32.mrf.mxu1  ;;  %2210 = vmatmul.bf16.vlgmr.msrb.gmra.mxu2 %v3979_v34  ;;  %2268 = vmatmul.bf16.vlgmr.msrb.gmra.mxu0 %v3979_v34  ;;  %v1760_v52 = vmul.f32 %v3963_v12, %v1706_v40  ;;  %v1742_v22 = vpop.f32.mrf.mxu3  ;;  %v3474_v40 = vld [vmem:[#allocation11 + $0x14c] sm:$0xf]  ;;  %v1788_v48 = vadd.f32 %v3968_v4, %v1766_v19  ;;  %v1787_v56 = vadd.f32 %v3971_v14, %v1765_v1 }
 0x343   : > { %2239 = vmatmul.bf16.vlgmr.msrb.gmra.mxu3 %v3981_v35  ;;  %2297 = vmatmul.bf16.vlgmr.msrb.gmra.mxu1 %v3981_v35  ;;  %v1761_v55 = vmul.f32 %v3965_v45, %v1735_v41  ;;  %v1767_v6 = vmul.f32 %v3965_v45, %v1742_v22  ;;  %v3137_v41 = vor.u32 %v3442_v39, %v3134_v37  ;;  %v1612_v39 = vmul.f32 0.015625, %v1611_v38 }
 0x344   : > { %v1782_v5 = vadd.f32 %v3968_v4, %v1760_v52  ;;  %2353 = vmatpush.bf16.msra.mxu3 %v3245_v36  ;;  %v3265_v43 = vor.u32 %v3474_v40, %v3262_v44  ;;  %2325 = vmatpush.bf16.msra.mxu2 %v3101_v26  ;;  %v1804_v2 = vmax.f32 %v1788_v48, 0.0  ;;  %v1803_v3 = vmax.f32 %v1787_v56, 0.0 }
 0x345   : > { %v1783_v15 = vadd.f32 %v3971_v14, %v1761_v55  ;;  %2381 = vmatpush.bf16.msra.mxu0 %v3137_v41  ;;  %v3246_v55 = vld [vmem:[#allocation11 + $0x138] sm:$0xf0]  ;;  %v1789_v57 = vadd.f32 %v3971_v14, %v1767_v6 }
 0x346   : > { %v1798_v0 = vmax.f32 %v1782_v5, 0.0  ;;  %2410 = vmatpush.bf16.msra.mxu1 %v3265_v43  ;;  %v3249_v58 = vor.u32 %v3470_v54, %v3246_v55 }
 0x347   : > { %v1799_v23 = vmax.f32 %v1783_v15, 0.0  ;;  %v1716_v28 = vpop.f32.mrf.mxu2  ;;  %v1805_v5 = vmax.f32 %v1789_v57, 0.0 }
 0x348   : > { %2354 = vmatpush.bf16.msra.mxu3 %v3229_v42 }
 0x349   : > { %v1708_v62 = vpop.f32.mrf.mxu0  ;;  %2382 = vmatpush.bf16.msra.mxu0 %v3121_v46  ;;  %v4013_v10 = vpack.c.bf16 %v1805_v5, %v1803_v3 }
 0x34a   : > { %v1762_v7 = vmul.f32 %v3963_v12, %v1708_v62  ;;  %v1737_v9 = vpop.f32.mrf.mxu1  ;;  %v1745_v52 = vpop.f32.mrf.mxu3  ;;  %v3230_v62 = vld [vmem:[#allocation11 + $0x118] sm:$0xf0]  ;;  %2411 = vmatpush.bf16.msra.mxu1 %v3249_v58 }
 0x34b   : > { %v1763_v16 = vmul.f32 %v3965_v45, %v1737_v9  ;;  %v4011_v9 = vpack.c.bf16 %v1804_v2, %v1802_v11  ;;  %v1769_v63 = vmul.f32 %v3965_v45, %v1745_v52 }
 0x34c   : > { %v1784_v17 = vadd.f32 %v3968_v4, %v1762_v7  ;;  %v3233_v7 = vor.u32 %v3466_v61, %v3230_v62 }
 0x34d   : > { %v1785_v18 = vadd.f32 %v3971_v14, %v1763_v16  ;;  %2383 = vmatpush.bf16.msra.mxu0 %v3105_v13 }
 0x34e   : > { %v1800_v21 = vmax.f32 %v1784_v17, 0.0  ;;  %2412 = vmatpush.bf16.msra.mxu1 %v3233_v7  ;;  %v1768_v17 = vmul.f32 %v3963_v12, %v1716_v28  ;;  %v1629_v28 = vlaneseq }
 0x34f   : > { %v1801_v24 = vmax.f32 %v1785_v18, 0.0  ;;  %v1718_v15 = vpop.f32.mrf.mxu2 }
 0x350   : > { %v3995_v25 = vpack.c.bf16 %v1800_v21, %v1798_v0  ;;  %v1770_v18 = vmul.f32 %v3963_v12, %v1718_v15  ;;  %v1790_v21 = vadd.f32 %v3968_v4, %v1768_v17  ;;  %v1609_v12 = vld [vmem:[#allocation4] sm:$0xf]  ;;  %vm1631_vm5 = vcmp.lt.s32.totalorder %v1629_v28, 512 }
 0x351   : > { %v3997_v29 = vpack.c.bf16 %v1801_v24, %v1799_v23  ;;  %v1791_v23 = vadd.f32 %v3971_v14, %v1769_v63 }
 0x352   : > { %2215 = vmatmul.bf16.gmra.mxu2 %v3995_v25  ;;  %2273 = vmatmul.bf16.gmra.mxu0 %v3995_v25  ;;  %v1747_v16 = vpop.f32.mrf.mxu3  ;;  %v1792_v22 = vadd.f32 %v3968_v4, %v1770_v18  ;;  %v1806_v30 = vmax.f32 %v1790_v21, 0.0 }
 0x353   : > { %2244 = vmatmul.bf16.gmra.mxu3 %v3997_v29  ;;  %2302 = vmatmul.bf16.gmra.mxu1 %v3997_v29  ;;  %v1771_v0 = vmul.f32 %v3965_v45, %v1747_v16  ;;  %v1807_v32 = vmax.f32 %v1791_v23, 0.0  ;;  %v1610_v45 = vmul.f32 0.015625, %v1609_v12 }
 0x354   : > { %v1808_v31 = vmax.f32 %v1792_v22, 0.0 }
 0x355   : > { %v1793_v24 = vadd.f32 %v3971_v14, %v1771_v0  ;;  %v1613_v1 = vmul.f32 %v1610_v45, %v1610_v45 }
 0x356   : > { %v1816_v19 = vpack.c.bf16 %v1808_v31, %v1806_v30 }
 0x357   : > { %v1809_v33 = vmax.f32 %v1793_v24, 0.0  ;;  %v1614_v4 = vsub.f32 %v1612_v39, %v1613_v1 }
 0x359   : > { %v1817_v20 = vpack.c.bf16 %v1809_v33, %v1807_v32  ;;  %v1615_v6 = vmax.f32 %v1614_v4, 0.0 }
 0x35b   : > { %v1617_v36 = vadd.f32 1e-05, %v1615_v6 }
 0x35d   : > { %3555 = vrsqrt.f32 %v1617_v36  ;;  %vm1624_vm2 = vweird.f32 %v1617_v36 }
 0x362   : > { %2220 = vmatmul.bf16.gmra.mxu2 %v4011_v9  ;;  %2278 = vmatmul.bf16.gmra.mxu0 %v4011_v9 }
 0x363   : > { %2249 = vmatmul.bf16.gmra.mxu3 %v4013_v10  ;;  %2307 = vmatmul.bf16.gmra.mxu1 %v4013_v10  ;;  %v3556_v14 = vpop.eup %3555 }
 0x364   : > { %v1619_v37 = vmul.f32 %v3556_v14, %v1617_v36  ;;  %vm1625_vm3 = vweird.f32 %v3556_v14  ;;  %v2550_v36 = vld [vmem:[%s4282_s7] sm:$0xf] }
 0x365   : > { %vm1626_vm4 = vmor %vm1624_vm2, %vm1625_vm3 }
 0x366   : > { %v1620_v40 = vmul.f32 %v3556_v14, %v1619_v37 }
 0x368   : > { %v1621_v41 = vmul.f32 0.5, %v1620_v40 }
 0x36a   : > { %v1622_v44 = vsub.f32 1.5, %v1621_v41 }
 0x36c   : > { %v1623_v8 = vmul.f32 %v3556_v14, %v1622_v44  ;;  %v4111_v44 = vperm.slane %v2550_v36, 0 }
 0x372   : > { %2225 = vmatmul.bf16.gmra.mxu2 %v1816_v19  ;;  %2283 = vmatmul.bf16.gmra.mxu0 %v1816_v19 }
 0x373   : > { %2254 = vmatmul.bf16.gmra.mxu3 %v1817_v20  ;;  %2312 = vmatmul.bf16.gmra.mxu1 %v1817_v20 }
 0x382   : > { %2326 = vmatmul.bf16.vlgmr.msra.gmra.mxu2 %v3979_v34  ;;  %2384 = vmatmul.bf16.vlgmr.msra.gmra.mxu0 %v3979_v34  ;;  %v1616_v34 = vld [vmem:[%s4280_s5] sm:$0xf] }
 0x383   : > { %2355 = vmatmul.bf16.vlgmr.msra.gmra.mxu3 %v3981_v35  ;;  %2413 = vmatmul.bf16.vlgmr.msra.gmra.mxu1 %v3981_v35  ;;  %v1627_v35 = vsel %vm1626_vm4, %v3556_v14, %v1623_v8 }
 0x384   : > { %v1628_v47 = vmul.f32 %v1627_v35, %v1616_v34 }
 0x386   : > { %v1635_v43 = vmul.f32 %v1628_v47, %v1610_v45  ;;  %1633 = vst.msk [vmem:[#allocation8] sm:$0xf] %vm1631_vm5, %v1628_v47 }
 0x38d   : > { %v2434_v18 = vld [vmem:[#allocation8] sm:$0xf] }
 0x38e   : > { %v4085_v0 = vperm.slane %v2434_v18, 0  ;;  %v4087_v22 = vperm.slane %v2434_v18, 1  ;;  %v4099_v38 = vperm.slane %v2434_v18, 3  ;;  %v4107_v40 = vperm.slane %v2434_v18, 2 }
 0x38f   : > { %v4123_v18 = vperm.slane %v2550_v36, 2 }
 0x392   : > { %2331 = vmatmul.bf16.gmra.mxu2 %v3995_v25  ;;  %2389 = vmatmul.bf16.gmra.mxu0 %v3995_v25  ;;  %v1634_v25 = vld [vmem:[%s4281_s6] sm:$0xf] }
 0x393   : > { %2360 = vmatmul.bf16.gmra.mxu3 %v3997_v29  ;;  %2418 = vmatmul.bf16.gmra.mxu1 %v3997_v29  ;;  %v1636_v26 = vsub.f32 %v1634_v25, %v1635_v43 }
 0x395   : > { %1637 = vst.msk [vmem:[#allocation9] sm:$0xf] %vm1631_vm5, %v1636_v26  ;;  %v4117_v26 = vperm.slane %v2550_v36, 1 }
 0x39c   : > { %v2476_v24 = vld [vmem:[#allocation9] sm:$0xf] }
 0x39d   : > { %v4094_v32 = vperm.slane %v2476_v24, 0  ;;  %v4097_v12 = vperm.slane %v2476_v24, 1  ;;  %v4109_v41 = vperm.slane %v2476_v24, 3  ;;  %v4114_v28 = vperm.slane %v2476_v24, 2 }
 0x3a2   : > { %2336 = vmatmul.bf16.gmra.mxu2 %v4011_v9  ;;  %2394 = vmatmul.bf16.gmra.mxu0 %v4011_v9 }
 0x3a3   : > { %2365 = vmatmul.bf16.gmra.mxu3 %v4013_v10  ;;  %2423 = vmatmul.bf16.gmra.mxu1 %v4013_v10 }
 0x3b2   : > { %2341 = vmatmul.bf16.gmra.mxu2 %v1816_v19  ;;  %2399 = vmatmul.bf16.gmra.mxu0 %v1816_v19 }
 0x3b3   : > { %2370 = vmatmul.bf16.gmra.mxu3 %v1817_v20  ;;  %2428 = vmatmul.bf16.gmra.mxu1 %v1817_v20 }
 0x3bf   : > { %v2269_v29 = vpop.f32.mrf.mxu0 }
 0x3c0   : > { %v2298_v27 = vpop.f32.mrf.mxu1 }
 0x3c1   : > { %v2299_v21 = vadd.f32 %v2298_v27, %v2269_v29 }
 0x3c3   : > { %v2445_v20 = vmul.f32 %v4087_v22, %v2299_v21 }
 0x3c5   : > { %v2211_v49 = vpop.f32.mrf.mxu2  ;;  %v2487_v6 = vadd.f32 %v4097_v12, %v2445_v20 }
 0x3c6   : > { %v2240_v50 = vpop.f32.mrf.mxu3 }
 0x3c7   : > { %v2271_v51 = vpop.f32.mrf.mxu0  ;;  %v2241_v63 = vadd.f32 %v2240_v50, %v2211_v49  ;;  %v2519_v27 = vmax.f32 %v2487_v6, 0.0 }
 0x3c8   : > { %v2300_v48 = vpop.f32.mrf.mxu1 }
 0x3c9   : > { %v2444_v31 = vmul.f32 %v4085_v0, %v2241_v63  ;;  %v2301_v4 = vadd.f32 %v2300_v48, %v2271_v51 }
 0x3cb   : > { %v2486_v39 = vadd.f32 %v4094_v32, %v2444_v31  ;;  %v2449_v25 = vmul.f32 %v4087_v22, %v2301_v4 }
 0x3cd   : > { %v2213_v52 = vpop.f32.mrf.mxu2  ;;  %v2518_v34 = vmax.f32 %v2486_v39, 0.0  ;;  %v2491_v21 = vadd.f32 %v4097_v12, %v2449_v25 }
 0x3ce   : > { %v2242_v42 = vpop.f32.mrf.mxu3 }
 0x3cf   : > { %v4045_v53 = vpop.f32.mrf.mxu0  ;;  %v2243_v1 = vadd.f32 %v2242_v42, %v2213_v52  ;;  %v2560_v63 = vmul.f32 %v4111_v44, %v2518_v34 }
 0x3d0   : > { %v4047_v54 = vpop.f32.mrf.mxu1 }
 0x3d1   : > { %v2448_v35 = vmul.f32 %v4085_v0, %v2243_v1  ;;  %v2304_v24 = vadd.f32 %v4047_v54, %v4045_v53 }
 0x3d3   : > { %v2490_v52 = vadd.f32 %v4094_v32, %v2448_v35  ;;  %v2453_v53 = vmul.f32 %v4087_v22, %v2304_v24 }
 0x3d5   : > { %v2216_v55 = vpop.f32.mrf.mxu2  ;;  %v2522_v1 = vmax.f32 %v2490_v52, 0.0 }
 0x3d6   : > { %v2245_v56 = vpop.f32.mrf.mxu3 }
 0x3d7   : > { %v4049_v57 = vpop.f32.mrf.mxu0  ;;  %v2246_v48 = vadd.f32 %v2245_v56, %v2216_v55  ;;  %v2561_v55 = vmul.f32 %v4117_v26, %v2519_v27 }
 0x3d8   : > { %v4051_v46 = vpop.f32.mrf.mxu1 }
 0x3d9   : > { %v2452_v56 = vmul.f32 %v4085_v0, %v2246_v48  ;;  %v2306_v48 = vadd.f32 %v4051_v46, %v4049_v57 }
 0x3db   : > { %v2494_v25 = vadd.f32 %v4094_v32, %v2452_v56  ;;  %v2457_v57 = vmul.f32 %v4087_v22, %v2306_v48 }
 0x3dd   : > { %v4053_v58 = vpop.f32.mrf.mxu2 }
 0x3de   : > { %v4055_v59 = vpop.f32.mrf.mxu3 }
 0x3df   : > { %v4057_v60 = vpop.f32.mrf.mxu0  ;;  %v2248_v27 = vadd.f32 %v4055_v59, %v4053_v58 }
 0x3e0   : > { %v4059_v61 = vpop.f32.mrf.mxu1 }
 0x3e1   : > { %v2456_v58 = vmul.f32 %v4085_v0, %v2248_v27 }
 0x3e5   : > { %v4061_v62 = vpop.f32.mrf.mxu2 }
 0x3e6   : > { %v4063_v11 = vpop.f32.mrf.mxu3 }
 0x3e7   : > { %v4065_v2 = vpop.f32.mrf.mxu0 }
 0x3e8   : > { %v4067_v13 = vpop.f32.mrf.mxu1 }
 0x3ed   : > { %v4069_v3 = vpop.f32.mrf.mxu2 }
 0x3ee   : > { %v4071_v5 = vpop.f32.mrf.mxu3 }
 0x3ef   : > { %v4073_v7 = vpop.f32.mrf.mxu0 }
 0x3f0   : > { %v4075_v9 = vpop.f32.mrf.mxu1 }
 0x3f5   : > { %v4077_v10 = vpop.f32.mrf.mxu2 }
 0x3f6   : > { %v4079_v15 = vpop.f32.mrf.mxu3 }
 0x3f7   : > { %v4081_v16 = vpop.f32.mrf.mxu0 }
 0x3f8   : > { %v4083_v17 = vpop.f32.mrf.mxu1 }
 0x3fd   : > { %v4089_v23 = vpop.f32.mrf.mxu2 }
 0x3fe   : > { %v4091_v30 = vpop.f32.mrf.mxu3 }
 0x3ff   : > { %v2385_v33 = vpop.f32.mrf.mxu0 }
 0x400   : > { %v2414_v19 = vpop.f32.mrf.mxu1 }
 0x401   : > { %v2415_v45 = vadd.f32 %v2414_v19, %v2385_v33 }
 0x403   : > { %v2447_v14 = vmul.f32 %v4099_v38, %v2415_v45  ;;  %v4130_v45 = vperm.slane %v2550_v36, 3 }
 0x405   : > { %v2327_v37 = vpop.f32.mrf.mxu2  ;;  %v2489_v51 = vadd.f32 %v4109_v41, %v2447_v14 }
 0x406   : > { %v2356_v8 = vpop.f32.mrf.mxu3 }
 0x407   : > { %v2357_v47 = vadd.f32 %v2356_v8, %v2327_v37  ;;  %v2387_v43 = vpop.f32.mrf.mxu0  ;;  %v2521_v20 = vmax.f32 %v2489_v51, 0.0  ;;  %v2592_v37 = vadd.f32 %v2561_v55, %v2560_v63  ;;  %v2523_v8 = vmax.f32 %v2491_v21, 0.0 }
 0x408   : > { %v2416_v29 = vpop.f32.mrf.mxu1  ;;  %v2495_v51 = vadd.f32 %v4097_v12, %v2453_v53  ;;  %v2251_v53 = vadd.f32 %v4063_v11, %v4061_v62 }
 0x409   : > { %v2446_v49 = vmul.f32 %v4107_v40, %v2357_v47  ;;  %v2417_v50 = vadd.f32 %v2416_v29, %v2387_v43  ;;  %v2563_v47 = vmul.f32 %v4130_v45, %v2521_v20  ;;  %v2564_v29 = vmul.f32 %v4111_v44, %v2522_v1 }
 0x40a   : > { %v2527_v56 = vmax.f32 %v2495_v51, 0.0  ;;  %v2460_v62 = vmul.f32 %v4085_v0, %v2251_v53 }
 0x40b   : > { %v2488_v42 = vadd.f32 %v4114_v28, %v2446_v49  ;;  %v2451_v31 = vmul.f32 %v4099_v38, %v2417_v50 }
 0x40d   : > { %v2520_v33 = vmax.f32 %v2488_v42, 0.0  ;;  %v2329_v19 = vpop.f32.mrf.mxu2  ;;  %v2493_v54 = vadd.f32 %v4109_v41, %v2451_v31  ;;  %v2565_v42 = vmul.f32 %v4117_v26, %v2523_v8  ;;  %v2526_v31 = vmax.f32 %v2494_v25, 0.0 }
 0x40e   : > { %v2358_v39 = vpop.f32.mrf.mxu3  ;;  %v2498_v8 = vadd.f32 %v4094_v32, %v2456_v58  ;;  %v2253_v58 = vadd.f32 %v4071_v5, %v4069_v3 }
 0x40f   : > { %v2359_v4 = vadd.f32 %v2358_v39, %v2329_v19  ;;  %v2390_v6 = vpop.f32.mrf.mxu0  ;;  %v2562_v14 = vmul.f32 %v4123_v18, %v2520_v33  ;;  %v2525_v52 = vmax.f32 %v2493_v54, 0.0  ;;  %v2597_v55 = vadd.f32 %v2565_v42, %v2564_v29 }
 0x410   : > { %v2419_v34 = vpop.f32.mrf.mxu1  ;;  %v2530_v51 = vmax.f32 %v2498_v8, 0.0  ;;  %v2464_v5 = vmul.f32 %v4085_v0, %v2253_v58 }
 0x411   : > { %v2450_v36 = vmul.f32 %v4107_v40, %v2359_v4  ;;  %v2420_v35 = vadd.f32 %v2419_v34, %v2390_v6  ;;  %v2593_v43 = vadd.f32 %v2592_v37, %v2562_v14  ;;  %v2567_v39 = vmul.f32 %v4130_v45, %v2525_v52 }
 0x412   : > { %v2568_v37 = vmul.f32 %v4111_v44, %v2526_v31 }
 0x413   : > { %v2492_v49 = vadd.f32 %v4114_v28, %v2450_v36  ;;  %v2594_v50 = vadd.f32 %v2593_v43, %v2563_v47  ;;  %v2455_v21 = vmul.f32 %v4099_v38, %v2420_v35  ;;  %v2499_v36 = vadd.f32 %v4097_v12, %v2457_v57 }
 0x414   : > { %v2309_v35 = vadd.f32 %v4059_v61, %v4057_v60  ;;  %v2569_v43 = vmul.f32 %v4117_v26, %v2527_v56  ;;  %v2311_v57 = vadd.f32 %v4067_v13, %v4065_v2 }
 0x415   : > { %v2524_v63 = vmax.f32 %v2492_v49, 0.0  ;;  %2595 = vadd.xlane.f32.xlu0 %v2594_v50  ;;  %v2332_v24 = vpop.f32.mrf.mxu2  ;;  %v2497_v14 = vadd.f32 %v4109_v41, %v2455_v21  ;;  %v2531_v42 = vmax.f32 %v2499_v36, 0.0 }
 0x416   : > { %v2361_v33 = vpop.f32.mrf.mxu3  ;;  %v2602_v50 = vadd.f32 %v2569_v43, %v2568_v37  ;;  %v2461_v60 = vmul.f32 %v4087_v22, %v2309_v35  ;;  %v2465_v2 = vmul.f32 %v4087_v22, %v2311_v57 }
 0x417   : > { %v2362_v59 = vadd.f32 %v2361_v33, %v2332_v24  ;;  %v2392_v19 = vpop.f32.mrf.mxu0  ;;  %v2566_v20 = vmul.f32 %v4123_v18, %v2524_v63  ;;  %v2529_v27 = vmax.f32 %v2497_v14, 0.0 }
 0x418   : > { %v2421_v46 = vpop.f32.mrf.mxu1  ;;  %v2503_v56 = vadd.f32 %v4097_v12, %v2461_v60 }
 0x419   : > { %v2454_v1 = vmul.f32 %v4107_v40, %v2362_v59  ;;  %v2422_v4 = vadd.f32 %v2421_v46, %v2392_v19  ;;  %v2598_v6 = vadd.f32 %v2597_v55, %v2566_v20  ;;  %v2571_v31 = vmul.f32 %v4130_v45, %v2529_v27 }
 0x41a   : > { %v2572_v59 = vmul.f32 %v4111_v44, %v2530_v51  ;;  %v2502_v19 = vadd.f32 %v4094_v32, %v2460_v62  ;;  %v2256_v27 = vadd.f32 %v4079_v15, %v4077_v10  ;;  %v2507_v62 = vadd.f32 %v4097_v12, %v2465_v2 }
 0x41b   : > { %v2496_v54 = vadd.f32 %v4114_v28, %v2454_v1  ;;  %v2599_v34 = vadd.f32 %v2598_v6, %v2567_v39  ;;  %v2459_v47 = vmul.f32 %v4099_v38, %v2422_v4  ;;  %v2573_v39 = vmul.f32 %v4117_v26, %v2531_v42 }
 0x41c   : > { %v2534_v14 = vmax.f32 %v2502_v19, 0.0  ;;  %v2468_v15 = vmul.f32 %v4085_v0, %v2256_v27  ;;  %v2539_v58 = vmax.f32 %v2507_v62, 0.0 }
 0x41d   : > { %v2528_v25 = vmax.f32 %v2496_v54, 0.0  ;;  %2600 = vadd.xlane.f32.xlu0 %v2599_v34  ;;  %v2334_v29 = vpop.f32.mrf.mxu2  ;;  %v2501_v61 = vadd.f32 %v4109_v41, %v2459_v47  ;;  %v2607_v54 = vadd.f32 %v2573_v39, %v2572_v59  ;;  %v2535_v34 = vmax.f32 %v2503_v56, 0.0 }
 0x41e   : > { %v2363_v49 = vpop.f32.mrf.mxu3  ;;  %v2576_v51 = vmul.f32 %v4111_v44, %v2534_v14  ;;  %v2258_v39 = vadd.f32 %v4091_v30, %v4089_v23 }
 0x41f   : > { %v2364_v11 = vadd.f32 %v2363_v49, %v2334_v29  ;;  %v2395_v48 = vpop.f32.mrf.mxu0  ;;  %v2570_v52 = vmul.f32 %v4123_v18, %v2528_v25  ;;  %v2533_v46 = vmax.f32 %v2501_v61, 0.0  ;;  %v2506_v29 = vadd.f32 %v4094_v32, %v2464_v5 }
 0x420   : > { %v2424_v63 = vpop.f32.mrf.mxu1  ;;  %v2577_v61 = vmul.f32 %v4117_v26, %v2535_v34  ;;  %v2472_v23 = vmul.f32 %v4085_v0, %v2258_v39 }
 0x421   : > { %v2458_v21 = vmul.f32 %v4107_v40, %v2364_v11  ;;  %v2425_v24 = vadd.f32 %v2424_v63, %v2395_v48  ;;  %v2603_v33 = vadd.f32 %v2602_v50, %v2570_v52  ;;  %v2575_v36 = vmul.f32 %v4130_v45, %v2533_v46 }
 0x422   : > { %v2314_v11 = vadd.f32 %v4075_v9, %v4073_v7  ;;  %v2538_v63 = vmax.f32 %v2506_v29, 0.0  ;;  %v2510_v46 = vadd.f32 %v4094_v32, %v2468_v15  ;;  %v2514_v0 = vadd.f32 %v4094_v32, %v2472_v23 }
 0x423   : > { %v2500_v20 = vadd.f32 %v4114_v28, %v2458_v21  ;;  %v2604_v55 = vadd.f32 %v2603_v33, %v2571_v31  ;;  %v2463_v4 = vmul.f32 %v4099_v38, %v2425_v24  ;;  %v2612_v33 = vadd.f32 %v2577_v61, %v2576_v51 }
 0x424   : > { %v2469_v7 = vmul.f32 %v4087_v22, %v2314_v11  ;;  %v2580_v57 = vmul.f32 %v4111_v44, %v2538_v63  ;;  %v2542_v2 = vmax.f32 %v2510_v46, 0.0  ;;  %v2546_v61 = vmax.f32 %v2514_v0, 0.0 }
 0x425   : > { %v2532_v1 = vmax.f32 %v2500_v20, 0.0  ;;  %2605 = vadd.xlane.f32.xlu1 %v2604_v55  ;;  %v2337_v3 = vpop.f32.mrf.mxu2  ;;  %v2505_v25 = vadd.f32 %v4109_v41, %v2463_v4 }
 0x426   : > { %v2366_v6 = vpop.f32.mrf.mxu3  ;;  %v2511_v5 = vadd.f32 %v4097_v12, %v2469_v7 }
 0x427   : > { %v2367_v37 = vadd.f32 %v2366_v6, %v2337_v3  ;;  %v2397_v8 = vpop.f32.mrf.mxu0  ;;  %v2574_v53 = vmul.f32 %v4123_v18, %v2532_v1  ;;  %v2537_v60 = vmax.f32 %v2505_v25, 0.0  ;;  %v2581_v3 = vmul.f32 %v4117_v26, %v2539_v58 }
 0x428   : > { %v2426_v13 = vpop.f32.mrf.mxu1  ;;  %v2316_v6 = vadd.f32 %v4083_v17, %v4081_v16 }
 0x429   : > { %v2462_v35 = vmul.f32 %v4107_v40, %v2367_v37  ;;  %v2427_v47 = vadd.f32 %v2426_v13, %v2397_v8  ;;  %v2608_v43 = vadd.f32 %v2607_v54, %v2574_v53  ;;  %v2579_v55 = vmul.f32 %v4130_v45, %v2537_v60 }
 0x42a   : > { %v2617_v34 = vadd.f32 %v2581_v3, %v2580_v57 }
 0x42b   : > { %v2504_v49 = vadd.f32 %v4114_v28, %v2462_v35  ;;  %v2609_v50 = vadd.f32 %v2608_v43, %v2575_v36  ;;  %v2467_v48 = vmul.f32 %v4099_v38, %v2427_v47  ;;  %v2543_v35 = vmax.f32 %v2511_v5, 0.0 }
 0x42c   : > { %v2473_v47 = vmul.f32 %v4087_v22, %v2316_v6 }
 0x42d   : > { %v2536_v52 = vmax.f32 %v2504_v49, 0.0  ;;  %2610 = vadd.xlane.f32.xlu1 %v2609_v50  ;;  %v2339_v42 = vpop.f32.mrf.mxu2  ;;  %v2509_v9 = vadd.f32 %v4109_v41, %v2467_v48  ;;  %v2584_v49 = vmul.f32 %v4111_v44, %v2542_v2  ;;  %v2585_v22 = vmul.f32 %v4117_v26, %v2543_v35 }
 0x42e   : > { %v2368_v10 = vpop.f32.mrf.mxu3  ;;  %v2515_v62 = vadd.f32 %v4097_v12, %v2473_v47 }
 0x42f   : > { %v2369_v21 = vadd.f32 %v2368_v10, %v2339_v42  ;;  %v2400_v24 = vpop.f32.mrf.mxu0  ;;  %v2578_v31 = vmul.f32 %v4123_v18, %v2536_v52  ;;  %v2541_v14 = vmax.f32 %v2509_v9, 0.0  ;;  %v2622_v15 = vadd.f32 %v2585_v22, %v2584_v49 }
 0x430   : > { %v2429_v59 = vpop.f32.mrf.mxu1  ;;  %v2547_v32 = vmax.f32 %v2515_v62, 0.0 }
 0x431   : > { %v2466_v19 = vmul.f32 %v4107_v40, %v2369_v21  ;;  %v2430_v20 = vadd.f32 %v2429_v59, %v2400_v24  ;;  %v2613_v56 = vadd.f32 %v2612_v33, %v2578_v31  ;;  %v2583_v16 = vmul.f32 %v4130_v45, %v2541_v14 }
 0x432   : > { %v2588_v33 = vmul.f32 %v4111_v44, %v2546_v61  ;;  %v2589_v7 = vmul.f32 %v4117_v26, %v2547_v32 }
 0x433   : > { %v2508_v1 = vadd.f32 %v4114_v28, %v2466_v19  ;;  %v2614_v4 = vadd.f32 %v2613_v56, %v2579_v55  ;;  %v2471_v8 = vmul.f32 %v4099_v38, %v2430_v20  ;;  %v2633_v56 = vstv %s2632_s28 }
 0x434   : > { %v2627_v20 = vadd.f32 %v2589_v7, %v2588_v33 }
 0x435   : > { %v2540_v37 = vmax.f32 %v2508_v1, 0.0  ;;  %2615 = vadd.xlane.f32.xlu2 %v2614_v4  ;;  %v2342_v53 = vpop.f32.mrf.mxu2  ;;  %v2513_v17 = vadd.f32 %v4109_v41, %v2471_v8 }
 0x436   : > { %v2371_v54 = vpop.f32.mrf.mxu3 }
 0x437   : > { %v2372_v30 = vadd.f32 %v2371_v54, %v2342_v53  ;;  %v2402_v13 = vpop.f32.mrf.mxu0  ;;  %v2582_v36 = vmul.f32 %v4123_v18, %v2540_v37  ;;  %v2545_v11 = vmax.f32 %v2513_v17, 0.0 }
 0x438   : > { %v2431_v43 = vpop.f32.mrf.mxu1 }
 0x439   : > { %v2470_v25 = vmul.f32 %v4107_v40, %v2372_v30  ;;  %v2432_v29 = vadd.f32 %v2431_v43, %v2402_v13  ;;  %v2618_v27 = vadd.f32 %v2617_v34, %v2582_v36  ;;  %v2587_v12 = vmul.f32 %v4130_v45, %v2545_v11 }
 0x43b   : > { %v2512_v50 = vadd.f32 %v4114_v28, %v2470_v25  ;;  %v2619_v51 = vadd.f32 %v2618_v27, %v2583_v16  ;;  %v2475_v52 = vmul.f32 %v4099_v38, %v2432_v29 }
 0x43d   : > { %v2544_v48 = vmax.f32 %v2512_v50, 0.0  ;;  %2620 = vadd.xlane.f32.xlu2 %v2619_v51  ;;  %v2344_v42 = vpop.f32.mrf.mxu2  ;;  %v2517_v21 = vadd.f32 %v4109_v41, %v2475_v52 }
 0x43e   : > { %v2373_v60 = vpop.f32.mrf.mxu3 }
 0x43f   : > { %v2374_v63 = vadd.f32 %v2373_v60, %v2344_v42  ;;  %v2586_v10 = vmul.f32 %v4123_v18, %v2544_v48  ;;  %v2549_v9 = vmax.f32 %v2517_v21, 0.0 }
 0x441   : > { %v2474_v24 = vmul.f32 %v4107_v40, %v2374_v63  ;;  %v2623_v31 = vadd.f32 %v2622_v15, %v2586_v10  ;;  %v2591_v41 = vmul.f32 %v4130_v45, %v2549_v9 }
 0x443   : > { %v2516_v38 = vadd.f32 %v4114_v28, %v2474_v24  ;;  %v2624_v58 = vadd.f32 %v2623_v31, %v2587_v12 }
 0x445   : > { %v2548_v59 = vmax.f32 %v2516_v38, 0.0  ;;  %2625 = vadd.xlane.f32.xlu0 %v2624_v58 }
 0x447   : > { %v2590_v19 = vmul.f32 %v4123_v18, %v2548_v59 }
 0x449   : > { %v2628_v55 = vadd.f32 %v2627_v20, %v2590_v19 }
 0x44b   : > { %v2629_v40 = vadd.f32 %v2628_v55, %v2591_v41 }
 0x44d   : > { %2630 = vadd.xlane.f32.xlu1 %v2629_v40 }
 0x488   : > { %v2596_v44 = vpop.xlane.xlu0 %2595 }
 0x489   : > { %v2634_v57 = vadd.f32 %v2633_v56, %v2596_v44 }
 0x48b   : > { %2643 = vst.msk [vmem:[%s4284_s9] sm:$0xff] %vm2642_vm6, %v2634_v57 }
 0x490   : > { %v2601_v28 = vpop.xlane.xlu0 %2600 }
 0x491   : > { %v2635_v26 = vadd.f32 %v2633_v56, %v2601_v28 }
 0x493   : > { %2644 = vst.msk [vmem:[%s4284_s9 + $0x8] sm:$0xff] %vm2642_vm6, %v2635_v26 }
 0x498   : > { %v2606_v18 = vpop.xlane.xlu1 %2605 }
 0x499   : > { %v2636_v45 = vadd.f32 %v2633_v56, %v2606_v18 }
 0x49b   : > { %2645 = vst.msk [vmem:[%s4284_s9 + $0x10] sm:$0xff] %vm2642_vm6, %v2636_v45 }
 0x4a0   : > { %v2611_v46 = vpop.xlane.xlu1 %2610 }
 0x4a1   : > { %v2637_v39 = vadd.f32 %v2633_v56, %v2611_v46 }
 0x4a3   : > { %2646 = vst.msk [vmem:[%s4284_s9 + $0x18] sm:$0xff] %vm2642_vm6, %v2637_v39 }
 0x4a8   : > { %v2616_v1 = vpop.xlane.xlu2 %2615 }
 0x4a9   : > { %v2638_v4 = vadd.f32 %v2633_v56, %v2616_v1 }
 0x4ab   : > { %2647 = vst.msk [vmem:[%s4284_s9 + $0x20] sm:$0xff] %vm2642_vm6, %v2638_v4 }
 0x4b0   : > { %v2621_v3 = vpop.xlane.xlu2 %2620 }
 0x4b1   : > { %v2639_v5 = vadd.f32 %v2633_v56, %v2621_v3 }
 0x4b3   : > { %2648 = vst.msk [vmem:[%s4284_s9 + $0x28] sm:$0xff] %vm2642_vm6, %v2639_v5 }
 0x4b8   : > { %v2626_v6 = vpop.xlane.xlu0 %2625 }
 0x4b9   : > { %v2640_v14 = vadd.f32 %v2633_v56, %v2626_v6 }
 0x4bb   : > { %2649 = vst.msk [vmem:[%s4284_s9 + $0x30] sm:$0xff] %vm2642_vm6, %v2640_v14 }
 0x4c0   : > { %v2631_v37 = vpop.xlane.xlu1 %2630 }
 0x4c1   : > { %v2641_v8 = vadd.f32 %v2633_v56, %v2631_v37 }
 0x4c3   : > { %2650 = vst.msk [vmem:[%s4284_s9 + $0x38] sm:$0xff] %vm2642_vm6, %v2641_v8 }
 0x4c4 PF: > { %s21_s13 = sadd.s32 1, %s3613_s13   ;;  %s4285_s11 = smov %s3609_s12 }
 0x4c5   : > { %p18_p11 = scmp.ge.s32.totalorder %s21_s13, 5   ;;  %s4286_s12 = smov %s4288_s14 }
 0x4c7   :  { %20 = sbr.rel (!%p18_p11) target bundleno = 4 (0x4), region = 115 }
 0x4cc   :  { %2673 = vsyncpa [#allocation12], 1 }
 0x4cd   :  { %2675 = vsyncpa [#allocation12 + $0x1], 1 }

</bundles_post_ra>
